<compile_context>
chip_gen: v6e
topology: v6e:2x2x1
jax: 0.10.0
libtpu: 0.0.40
codegen_flags: <defaults>
</compile_context>

<pallas_src>
import jax
import jax.numpy as jnp
from jax.experimental import pallas as pl
from jax.experimental.pallas import tpu as pltpu

HIDDEN = 768
TM_MAX = 1024                          # two-pass row tile (large: ~0.35us/step overhead)
FUSED_TM_MAX = 512                     # fused-path row tile (leave room for y scratch)
FUSED_Y_BYTES_MAX = 12 * 1024 * 1024   # enable fused path while y (bf16) <= 12 MiB
VMEM_LIMIT = 32 * 1024 * 1024          # scoped VMEM budget (safe on v5e/v6e/v7x)


def _round_up(a, b):
    return ((a + b - 1) // b) * b


def _row_mask(i, tm, m_valid):
    row = i * tm + jax.lax.broadcasted_iota(jnp.int32, (tm, 1), 0)
    return row < m_valid


# --------------------------------------------------------------------------
# Two-pass path
# --------------------------------------------------------------------------

def _make_linear_partials_kernel(tm, m_valid, masked):
    """Pass 1: y = x @ Wt + b (MXU, bf16 in / f32 acc); per-tile partial ssq."""

    def kernel(x_ref, w_ref, b_ref, y_ref, part_ref):
        i = pl.program_id(0)
        # Cast x to bf16 in-kernel (avoids a separate XLA cast pass over HBM).
        y = jnp.dot(x_ref[...].astype(jnp.bfloat16), w_ref[...],
                    preferred_element_type=jnp.float32)
        y = y + b_ref[...]                                   # f32 bias add (VPU)

        sq = y * y
        if masked:
            # Padded rows must not contribute to the global norm.
            sq = jnp.where(_row_mask(i, tm, m_valid), sq, 0.0)

        # Per-tile partial sums, reduced over the row (sublane) axis only.
        # Each grid step owns its own (1, 768) lane-dense block -> no shared
        # accumulator -> the grid axis can be megacore-parallel (v7x).
        part_ref[...] = jnp.sum(sq, axis=0, keepdims=True)

        # Intermediate y stored in bf16 (halves Pass-1 writeback / Pass-2 read).
        y_ref[...] = y.astype(y_ref.dtype)

    return kernel


def _scale_kernel(ssq_ref, y_ref, o_ref):
    """Pass 2: out = y * rsqrt(global sum of squares)."""
    inv = jax.lax.rsqrt(ssq_ref[...])                        # (1,1), EUP rsqrt
    o_ref[...] = (y_ref[...].astype(jnp.float32) * inv).astype(o_ref.dtype)


def _two_pass(x2d, w_t, b2d, m, orig_dtype, tm_max):
    tm = min(tm_max, _round_up(m, 16))
    m_pad = _round_up(m, tm)
    if m_pad != m:
        x2d = jnp.pad(x2d, ((0, m_pad - m), (0, 0)))
    nt = m_pad // tm
    grid = (nt,)

    # ---- Pass 1: tiled matmul + per-tile partial sums of squares ----------
    y, partials = pl.pallas_call(
        _make_linear_partials_kernel(tm, m, masked=(m_pad != m)),
        out_shape=(
            jax.ShapeDtypeStruct((m_pad, HIDDEN), jnp.bfloat16),     # y (bf16)
            jax.ShapeDtypeStruct((1, nt * HIDDEN), jnp.float32),     # partial ssq
        ),
        grid=grid,
        in_specs=[
            pl.BlockSpec((tm, HIDDEN), lambda i: (i, 0)),            # x tile
            pl.BlockSpec((HIDDEN, HIDDEN), lambda i: (0, 0)),        # W (resident)
            pl.BlockSpec((1, HIDDEN), lambda i: (0, 0)),             # bias (resident)
        ],
        out_specs=(
            pl.BlockSpec((tm, HIDDEN), lambda i: (i, 0)),            # y tile
            pl.BlockSpec((1, HIDDEN), lambda i: (0, i)),             # per-tile partials
        ),
        compiler_params=pltpu.CompilerParams(
            # No shared accumulator -> safe to megacore-parallelize (v7x 2 TCs).
            dimension_semantics=("parallel",),
            vmem_limit_bytes=VMEM_LIMIT,
        ),
    )(x2d, w_t, b2d)

    # Tiny reduction of the per-tile partials to the global scalar.
    ssq = jnp.sum(partials).reshape(1, 1)

    # ---- Pass 2: scale every row by the global inverse norm ---------------
    # TODO(synk): alias y -> out via input_output_aliases when orig_dtype is bf16.
    out = pl.pallas_call(
        _scale_kernel,
        out_shape=jax.ShapeDtypeStruct((m_pad, HIDDEN), orig_dtype),
        grid=grid,
        in_specs=[
            pl.BlockSpec((1, 1), lambda i: (0, 0)),                  # ssq (resident)
            pl.BlockSpec((tm, HIDDEN), lambda i: (i, 0)),            # y tile (bf16)
        ],
        out_specs=pl.BlockSpec((tm, HIDDEN), lambda i: (i, 0)),
        compiler_params=pltpu.CompilerParams(
            dimension_semantics=("parallel",),
            vmem_limit_bytes=VMEM_LIMIT,
        ),
    )(ssq, y)

    if m_pad != m:
        out = out[:m]
    return out


# --------------------------------------------------------------------------
# Fused single-kernel path (y resident in VMEM; no HBM round trip for y)
# --------------------------------------------------------------------------

def _make_fused_kernel(tm, m_valid, masked):
    def kernel(x_ref, w_ref, b_ref, o_ref, y_scr, ssq_scr):
        p = pl.program_id(0)           # phase: 0 = matmul+ssq, 1 = scale
        i = pl.program_id(1)           # row tile
        row0 = pl.multiple_of(i * tm, tm)

        @pl.when(p == 0)
        def _matmul_phase():
            @pl.when(i == 0)
            def _init():
                ssq_scr[...] = jnp.zeros_like(ssq_scr)

            y = jnp.dot(x_ref[...].astype(jnp.bfloat16), w_ref[...],
                        preferred_element_type=jnp.float32)
            y = y + b_ref[...]
            sq = y * y
            if masked:
                sq = jnp.where(_row_mask(i, tm, m_valid), sq, 0.0)
            ssq_scr[...] += jnp.sum(sq)
            y_scr[pl.ds(row0, tm), :] = y.astype(y_scr.dtype)

        @pl.when(p == 1)
        def _scale_phase():
            inv = jax.lax.rsqrt(ssq_scr[...])                        # (1,1)
            y = y_scr[pl.ds(row0, tm), :].astype(jnp.float32)
            o_ref[...] = (y * inv).astype(o_ref.dtype)

    return kernel


def _fused(x2d, w_t, b2d, m, orig_dtype, tm):
    m_pad = _round_up(m, tm)
    if m_pad != m:
        x2d = jnp.pad(x2d, ((0, m_pad - m), (0, 0)))
    nt = m_pad // tm

    out = pl.pallas_call(
        _make_fused_kernel(tm, m, masked=(m_pad != m)),
        out_shape=jax.ShapeDtypeStruct((m_pad, HIDDEN), orig_dtype),
        grid=(2, nt),                                                # phase-major
        in_specs=[
            # x: tile i during phase 0, pinned to block 0 during phase 1
            # (avoids re-streaming x in the scale phase).
            pl.BlockSpec((tm, HIDDEN), lambda p, i: (i * (1 - p), 0)),
            pl.BlockSpec((HIDDEN, HIDDEN), lambda p, i: (0, 0)),     # W (resident)
            pl.BlockSpec((1, HIDDEN), lambda p, i: (0, 0)),          # bias (resident)
        ],
        # out: pinned to block 0 during phase 0 (never written there), tile i
        # during phase 1 -> each block is flushed exactly once with valid data.
        out_specs=pl.BlockSpec((tm, HIDDEN), lambda p, i: (i * p, 0)),
        scratch_shapes=[
            pltpu.VMEM((m_pad, HIDDEN), jnp.bfloat16),               # resident y
            pltpu.VMEM((1, 1), jnp.float32),                         # global ssq
        ],
        compiler_params=pltpu.CompilerParams(
            # Phase 1 depends on all of phase 0 through the shared scratch ->
            # must stay serial on one TensorCore.
            dimension_semantics=("arbitrary", "arbitrary"),
            vmem_limit_bytes=VMEM_LIMIT,
        ),
    )(x2d, w_t, b2d)

    if m_pad != m:
        out = out[:m]
    return out


# --------------------------------------------------------------------------
# Public wrapper
# --------------------------------------------------------------------------

def bertnet_forward(x, weight, bias, *, allow_fused=True):
    """x: (..., 768); weight: (768, 768) torch layout (out, in); bias: (768,)."""
    orig_shape = x.shape
    orig_dtype = x.dtype
    assert orig_shape[-1] == HIDDEN

    x2d = x.reshape(-1, HIDDEN)
    m = x2d.shape[0]

    # Weight cast is one-time and tiny (768x768); bias kept in f32.
    w_t = weight.T.astype(jnp.bfloat16)                      # (in, out): y = x @ w_t
    b2d = bias.reshape(1, HIDDEN).astype(jnp.float32)

    tm_fused = min(FUSED_TM_MAX, _round_up(m, 16))
    m_pad_fused = _round_up(m, tm_fused)
    fused_ok = allow_fused and (m_pad_fused * HIDDEN * 2 <= FUSED_Y_BYTES_MAX)

    if fused_ok:
        out = _fused(x2d, w_t, b2d, m, orig_dtype, tm_fused)
    else:
        out = _two_pass(x2d, w_t, b2d, m, orig_dtype, TM_MAX)

    return out.reshape(orig_shape)


if __name__ == "__main__":
    key = jax.random.PRNGKey(0)
    kx, kw, kb = jax.random.split(key, 3)

    batch, seq = 2, 8
    x = jax.random.normal(kx, (batch, seq, HIDDEN), dtype=jnp.float32)

    # torch nn.Linear shapes: W (out, in), b (out,)
    weight = jax.random.normal(kw, (HIDDEN, HIDDEN), dtype=jnp.float32) * 0.02
    bias = jax.random.normal(kb, (HIDDEN,), dtype=jnp.float32) * 0.02

    # Plain-JAX f32 reference (bf16 MXU inputs -> loosened tolerance).
    ref = x @ weight.T + bias
    ref = ref / jnp.linalg.norm(ref)

    # Fused path (exercised for this small size).
    out_fused = jax.block_until_ready(bertnet_forward(x, weight, bias))
    assert out_fused.shape == ref.shape
    assert jnp.allclose(out_fused, ref, atol=1e-3, rtol=1e-2), "fused mismatch"

    # Two-pass path (forced), to validate the large-input code path too.
    out_2p = jax.block_until_ready(bertnet_forward(x, weight, bias, allow_fused=False))
    assert out_2p.shape == ref.shape
    assert jnp.allclose(out_2p, ref, atol=1e-3, rtol=1e-2), "two-pass mismatch"

    print("KERNEL_OK")
</pallas_src>

<mosaic_0001>
module attributes {stable_mosaic.version = 11 : i64} {
  func.func @kernel(%arg0: i32, %arg1: i32, %arg2: memref<16x768xf32, #tpu.memory_space<vmem>>, %arg3: memref<768x768xbf16, #tpu.memory_space<vmem>>, %arg4: memref<1x768xf32, #tpu.memory_space<vmem>>, %arg5: memref<16x768xf32, #tpu.memory_space<vmem>>, %arg6: memref<16x768xbf16, #tpu.memory_space<vmem>>, %arg7: memref<1x1xf32, #tpu.memory_space<vmem>>) attributes {dimension_semantics = [#tpu.dimension_semantics<arbitrary>, #tpu.dimension_semantics<arbitrary>], iteration_bounds = array<i64: 2, 1>, scalar_prefetch = 0 : i64, scratch_operands = 2 : i64, tpu.core_type = #tpu.core_type<tc>, window_params = [{transform_indices = @transform_0, window_bounds = array<i64: 16, 768>}, {pipeline_mode = #tpu.pipeline_mode<synchronous>, transform_indices = @transform_1, window_bounds = array<i64: 768, 768>}, {pipeline_mode = #tpu.pipeline_mode<synchronous>, transform_indices = @transform_2, window_bounds = array<i64: 1, 768>}, {transform_indices = @transform_3, window_bounds = array<i64: 16, 768>}]} {
    %c16_i32 = arith.constant 16 : i32
    %0 = arith.muli %arg1, %c16_i32 : i32
    %1 = tpu.assume_multiple %0, 16 : i32
    %c0_i32 = arith.constant 0 : i32
    %2 = arith.cmpi eq, %arg0, %c0_i32 : i32
    %3 = arith.extui %2 : i1 to i32
    %c0_i32_0 = arith.constant 0 : i32
    %4 = arith.cmpi ne, %3, %c0_i32_0 : i32
    scf.if %4 {
      %c0_i32_2 = arith.constant 0 : i32
      %8 = arith.cmpi eq, %arg1, %c0_i32_2 : i32
      %9 = arith.extui %8 : i1 to i32
      %c0_i32_3 = arith.constant 0 : i32
      %10 = arith.cmpi ne, %9, %c0_i32_3 : i32
      scf.if %10 {
        %cst_15 = arith.constant 0.000000e+00 : f32
        %30 = vector.broadcast %cst_15 : f32 to vector<1x1xf32>
        %c0_16 = arith.constant 0 : index
        %c0_17 = arith.constant 0 : index
        %31 = vector.load %arg7[%c0_16, %c0_17] : memref<1x1xf32, #tpu.memory_space<vmem>>, vector<1x1xf32>
        tpu.vector_store %arg7[%c0_16, %c0_17], %30 {strides = array<i32>} : memref<1x1xf32, #tpu.memory_space<vmem>>, vector<1x1xf32>,
      } else {
      }
      %c0 = arith.constant 0 : index
      %c0_4 = arith.constant 0 : index
      %11 = vector.load %arg2[%c0, %c0_4] : memref<16x768xf32, #tpu.memory_space<vmem>>, vector<16x768xf32>
      %12 = arith.truncf %11 : vector<16x768xf32> to vector<16x768xbf16>
      %c0_5 = arith.constant 0 : index
      %c0_6 = arith.constant 0 : index
      %13 = vector.load %arg3[%c0_5, %c0_6] : memref<768x768xbf16, #tpu.memory_space<vmem>>, vector<768x768xbf16>
      %cst = arith.constant dense<0.000000e+00> : vector<16x768xf32>
      %14 = tpu.matmul %12, %13, %cst {dimension_numbers = #tpu.dot_dimension_numbers<[1], [0], [0], [1], [0, 0, 1, 1], [], []>} : vector<16x768xbf16>, vector<768x768xbf16>, vector<16x768xf32> -> vector<16x768xf32>
      %c0_7 = arith.constant 0 : index
      %c0_8 = arith.constant 0 : index
      %15 = vector.load %arg4[%c0_7, %c0_8] : memref<1x768xf32, #tpu.memory_space<vmem>>, vector<1x768xf32>
      %16 = vector.broadcast %15 : vector<1x768xf32> to vector<16x768xf32>
      %17 = arith.addf %14, %16 : vector<16x768xf32>
      %18 = arith.mulf %17, %17 : vector<16x768xf32>
      %c0_9 = arith.constant 0 : index
      %c0_10 = arith.constant 0 : index
      %19 = vector.load %arg7[%c0_9, %c0_10] : memref<1x1xf32, #tpu.memory_space<vmem>>, vector<1x1xf32>
      %20 = vector.shape_cast %18 : vector<16x768xf32> to vector<1x16x768xf32>
      %cst_11 = arith.constant dense<0.000000e+00> : vector<1xf32>
      %21 = vector.multi_reduction <add>, %20, %cst_11 [1, 2] : vector<1x16x768xf32> to vector<1xf32>
      %22 = vector.shape_cast %21 : vector<1xf32> to vector<1x1x1xf32>
      %23 = vector.extract %22[0, 0, 0] : f32 from vector<1x1x1xf32>
      %24 = vector.broadcast %23 : f32 to vector<1x1xf32>
      %25 = arith.addf %19, %24 : vector<1x1xf32>
      %c0_12 = arith.constant 0 : index
      %c0_13 = arith.constant 0 : index
      %26 = vector.load %arg7[%c0_12, %c0_13] : memref<1x1xf32, #tpu.memory_space<vmem>>, vector<1x1xf32>
      tpu.vector_store %arg7[%c0_12, %c0_13], %25 {strides = array<i32>} : memref<1x1xf32, #tpu.memory_space<vmem>>, vector<1x1xf32>,
      %27 = arith.truncf %17 : vector<16x768xf32> to vector<16x768xbf16>
      %28 = arith.index_cast %1 : i32 to index
      %c0_14 = arith.constant 0 : index
      %29 = vector.load %arg6[%28, %c0_14] : memref<16x768xbf16, #tpu.memory_space<vmem>>, vector<16x768xbf16>
      tpu.vector_store %arg6[%28, %c0_14], %27 {strides = array<i32>} : memref<16x768xbf16, #tpu.memory_space<vmem>>, vector<16x768xbf16>,
    } else {
    }
    %c1_i32 = arith.constant 1 : i32
    %5 = arith.cmpi eq, %arg0, %c1_i32 : i32
    %6 = arith.extui %5 : i1 to i32
    %c0_i32_1 = arith.constant 0 : i32
    %7 = arith.cmpi ne, %6, %c0_i32_1 : i32
    scf.if %7 {
      %c0 = arith.constant 0 : index
      %c0_2 = arith.constant 0 : index
      %8 = vector.load %arg7[%c0, %c0_2] : memref<1x1xf32, #tpu.memory_space<vmem>>, vector<1x1xf32>
      %9 = math.rsqrt %8 : vector<1x1xf32>
      %10 = arith.index_cast %1 : i32 to index
      %c0_3 = arith.constant 0 : index
      %11 = vector.load %arg6[%10, %c0_3] : memref<16x768xbf16, #tpu.memory_space<vmem>>, vector<16x768xbf16>
      %12 = arith.extf %11 : vector<16x768xbf16> to vector<16x768xf32>
      %13 = vector.broadcast %9 : vector<1x1xf32> to vector<16x768xf32>
      %14 = arith.mulf %12, %13 : vector<16x768xf32>
      %c0_4 = arith.constant 0 : index
      %c0_5 = arith.constant 0 : index
      %15 = vector.load %arg5[%c0_4, %c0_5] : memref<16x768xf32, #tpu.memory_space<vmem>>, vector<16x768xf32>
      tpu.vector_store %arg5[%c0_4, %c0_5], %14 {strides = array<i32>} : memref<16x768xf32, #tpu.memory_space<vmem>>, vector<16x768xf32>,
    } else {
    }
    return
  }
  func.func @transform_0(%arg0: i32, %arg1: i32) -> (i32, i32) {
    %c1_i32 = arith.constant 1 : i32
    %0 = arith.subi %c1_i32, %arg0 : i32
    %1 = arith.muli %arg1, %0 : i32
    %c0_i32 = arith.constant 0 : i32
    %c0_i32_0 = arith.constant 0 : i32
    return %1, %c0_i32 : i32, i32
  }
  func.func @transform_1(%arg0: i32, %arg1: i32) -> (i32, i32) {
    %c0_i32 = arith.constant 0 : i32
    %c0_i32_0 = arith.constant 0 : i32
    %c0_i32_1 = arith.constant 0 : i32
    return %c0_i32, %c0_i32_0 : i32, i32
  }
  func.func @transform_2(%arg0: i32, %arg1: i32) -> (i32, i32) {
    %c0_i32 = arith.constant 0 : i32
    %c0_i32_0 = arith.constant 0 : i32
    %c0_i32_1 = arith.constant 0 : i32
    return %c0_i32, %c0_i32_0 : i32, i32
  }
  func.func @transform_3(%arg0: i32, %arg1: i32) -> (i32, i32) {
    %0 = arith.muli %arg1, %arg0 : i32
    %c0_i32 = arith.constant 0 : i32
    %c0_i32_0 = arith.constant 0 : i32
    return %0, %c0_i32 : i32, i32
  }
}

</mosaic_0001>

<bundles_post_ra>
// kernel: tpu_custom_call.1
= control target key start
LH: loop header
LB: loop body
LE: loop exit
PB: predicated region body
PF: predicated region fallthrough
CT: control target
= control target key end

     0   :  { %8 = vsyncpa [#allocation5], 0  ;;  %s3853_s0 = inlined_call_operand.hbm [shape: f32[16,768], index: 0, kind: input, shape index: {}]   ;;  %s3854_s1 = inlined_call_operand.hbm [shape: bf16[768,768], index: 1, kind: input, shape index: {}]   ;;  %s3855_s2 = inlined_call_operand.hbm [shape: f32[1,768], index: 2, kind: input, shape index: {}]   ;;  %s3856_s3 = inlined_call_operand.hbm [shape: f32[16,768], index: 3, kind: output, shape index: {}]  }
   0x1   :  { %10 = vsyncpa [#allocation5 + $0x1], 0 }
   0x2   :  { %11 = vsyncpa [#allocation8], 0 }
   0x3   :  { %12 = vsyncpa [#allocation6], 0 }
   0x4   :  { %14 = vsyncpa [#allocation6 + $0x1], 0  ;;  %s3685_s12 = smov 0   ;;  %s3687_s13 = smov 0  }
   0x5   :  { %s3689_s14 = smov 0  }
   0x6 LB: > { %s2684_s15 = sadd.s32 4294967295, %s3651_s14   ;;  %s2685_s16 = sadd.s32 4294967294, %s3651_s14   ;;  %s3651_s14 = sphi %s3689_s14, %s20_s14   ;;  %s3647_s13 = sphi %s3687_s13, %s3864_s13   ;;  %s3643_s12 = sphi %s3685_s12, %s3863_s12  }
   0x7   : > { %s32_s17 = sadd.s32 1, %s3647_s13  ;;  %p2686_p0 = scmp.ge.s32.totalorder %s3651_s14, 1 }
   0x8   : > { %p34_p1 = scmp.ge.s32.totalorder %s32_s17, 2  ;;  %p137_p2 = scmp.lt.s32.totalorder %s3651_s14, 3 }
   0x9   : > { %p3707_p3 = scmp.eq.s32.totalorder %s2684_s15, 0  ;;  %s3653_s20 = smov [#allocation7]  }
   0xa   : > { %s3866_s17 = smov (%p34_p1, %s32_s17), 0  ;;  %p3713_p4 = pnand %p2686_p0, %p137_p2 }
   0xb   : > { %s149_s21 = sshll.u32 %s3653_s20, 4  ;;  %p3036_p8 = scmp.lt.s32.totalorder %s3651_s14, 2  ;;  %s150_s21 = int_to_ptr.vmem [resolvable:$true] %s149_s21 }
   0xc   : > { %p3019_p5 = pneg %p3713_p4  ;;  %s3654_s23 = smov [#allocation9]  }
   0xd   : > { %s163_s24 = sshll.u32 %s3654_s23, 4  ;;  %s3526_s25 = scalar_lea.vmem %s150_s21, 36864  ;;  %s164_s24 = int_to_ptr.vmem [resolvable:$true] %s163_s24 }
   0xe   : > { %p3722_p7 = pnand %p3707_p3, %p3019_p5  ;;  %p3527_p10 = scmp.ne.s32.totalorder %s150_s21, %s3526_s25 }
   0xf   : > { %p3534_p13 = scmp.lt.s32.totalorder %s150_s21, %s150_s21  ;;  %p3535_p0 = scmp.lt.s32.totalorder %s3526_s25, %s3526_s25 }
  0x10   : > { %p3517_p9 = pneg %p3722_p7 }
  0x11   : > { %p3536_p1 = por %p3535_p0, %p3534_p13 }
  0x12   : > { %p3529_p11 = pnand %p3527_p10, %p3517_p9 }
  0x14   : > { %p3530_p12 = pneg %p3529_p11 }
  0x16   : > { %p3537_p2 = pnand %p3536_p1, %p3530_p12 }
  0x18   : > { %3540 = shalt.err (!%p3537_p2)
}
  0x19   : > { %s3655_s26 = smov 384   ;;  %s3656_s27 = smov 24  }
  0x1a   : > { %3022 = dma.hbm_to_vmem [thread:$0]  (!%p3722_p7), %s3854_s1, 36864, %s150_s21, [#allocation8], %s3655_s26, %s3655_s26, %s3656_s27  }
  0x1b   : > { %p3037_p5 = scmp.eq.s32.totalorder %s3651_s14, 0  ;;  %s3552_s30 = scalar_lea.vmem %s164_s24, 96 }
  0x1c   : > { %p3553_p10 = scmp.ne.s32.totalorder %s164_s24, %s3552_s30  ;;  %p3560_p12 = scmp.lt.s32.totalorder %s164_s24, %s164_s24 }
  0x1d   : > { %p3561_p0 = scmp.lt.s32.totalorder %s3552_s30, %s3552_s30 }
  0x1e   : > { %p3555_p11 = pnand %p3553_p10, %p3517_p9 }
  0x1f   : > { %p3562_p1 = por %p3561_p0, %p3560_p12 }
  0x20   : > { %p3556_p13 = pneg %p3555_p11 }
  0x22   : > { %p3563_p2 = pnand %p3562_p1, %p3556_p13 }
  0x24   : > { %3566 = shalt.err (!%p3563_p2)
}
  0x25   : > { %3025 = dma.hbm_to_vmem [thread:$0]  (!%p3722_p7), %s3855_s2, 96, %s164_s24, [#allocation8]  }
  0x26   : > { %p3748_p6 = pnand %p3037_p5, %p3036_p8  ;;  %s3657_s7 = smov [#allocation4]  }
  0x27   : > { %s188_s8 = sshll.u32 %s3657_s7, 4  ;;  %s189_s8 = int_to_ptr.vmem [resolvable:$true] %s188_s8 }
  0x28   : > { %p3569_p9 = pneg %p3748_p6  ;;  %s3578_s9 = scalar_lea.vmem %s189_s8, 1536 }
  0x29   : > { %p3579_p10 = scmp.ne.s32.totalorder %s189_s8, %s3578_s9  ;;  %s3585_s10 = scalar_lea.vmem %s189_s8, 3072 }
  0x2a   : > { %p3586_p12 = scmp.lt.s32.totalorder %s189_s8, %s189_s8  ;;  %p3587_p0 = scmp.lt.s32.totalorder %s3585_s10, %s3578_s9 }
  0x2b   : > { %p3581_p11 = pnand %p3579_p10, %p3569_p9 }
  0x2c   : > { %p3588_p1 = por %p3587_p0, %p3586_p12 }
  0x2d   : > { %p3582_p13 = pneg %p3581_p11 }
  0x2f   : > { %p3589_p7 = pnand %p3588_p1, %p3582_p13 }
  0x31   : > { %3592 = shalt.err (!%p3589_p7)
}
  0x32   : > { %s3658_s11 = smov 768   ;;  %s3659_s20 = smov 48  }
  0x33   : > { %3029 = dma.hbm_to_vmem [thread:$0]  (!%p3748_p6), %s3853_s0, 1536, %s189_s8, [#allocation5], %s3658_s11, %s3658_s11, %s3659_s20  }
  0x34   : > { %200 = sbr.rel (%p3713_p4) target bundleno = 976 (0x3d0), region = 32 }
  0x39   : > { %3630 = dma.done.wait (%p3707_p3), [#allocation5], 1536  }
  0x3a   : > { %3632 = vsyncadd (%p3707_p3), [#allocation5], 4294965760 }
  0x3b   : > { %3634 = dma.done.wait (%p3707_p3), [#allocation8], 36960  }
  0x3c   : > { %3636 = vsyncadd (%p3707_p3), [#allocation8], 4294930336  ;;  %p2695_p8 = scmp.ne.s32.totalorder %s3643_s12, 0 }
  0x3e   : > { %246 = sbr.rel (%p2695_p8) target bundleno = 805 (0x325), region = 48 }
  0x43   : > { %v3080_v0 = vld [vmem:[#allocation7 + $0x154] ss:$24 sps:$4 sm:$0xff]   ;;  %v3082_v1 = vld [vmem:[#allocation7 + $0x150] ss:$24 sps:$4 sm:$0xff]   ;;  %v3086_v4 = vld [vmem:[#allocation7 + $0x124] ss:$24 sps:$4 sm:$0xff]  }
  0x44   : > { %2031 = vmatprep.subr.bf16.mxu0 %v3080_v0  ;;  %v3083_v2 = vld [vmem:[#allocation7 + $0x454] ss:$24 sps:$4 sm:$0xff]   ;;  %v3085_v3 = vld [vmem:[#allocation7 + $0x450] ss:$24 sps:$4 sm:$0xff]   ;;  %v3088_v5 = vld [vmem:[#allocation7 + $0x120] ss:$24 sps:$4 sm:$0xff]  }
  0x45   : > { %2032 = vmatpush1.bf16.msra.mxu0 %v3082_v1  ;;  %2074 = vmatprep.subr.bf16.mxu1 %v3083_v2  ;;  %v3089_v6 = vld [vmem:[#allocation7 + $0x424] ss:$24 sps:$4 sm:$0xff]   ;;  %v3091_v7 = vld [vmem:[#allocation7 + $0x420] ss:$24 sps:$4 sm:$0xff]   ;;  %v3092_v8 = vld [vmem:[#allocation7 + $0xf4] ss:$24 sps:$4 sm:$0xff]  }
  0x46   : > { %2075 = vmatpush1.bf16.msra.mxu1 %v3085_v3  ;;  %2033 = vmatprep.subr.bf16.mxu0 %v3086_v4  ;;  %v3094_v9 = vld [vmem:[#allocation7 + $0xf0] ss:$24 sps:$4 sm:$0xff]   ;;  %v3095_v10 = vld [vmem:[#allocation7 + $0x3f4] ss:$24 sps:$4 sm:$0xff]   ;;  %v3098_v11 = vld [vmem:[#allocation7 + $0xc4] ss:$24 sps:$4 sm:$0xff]  }
  0x47   : > { %2076 = vmatprep.subr.bf16.mxu1 %v3089_v6  ;;  %v3097_v12 = vld [vmem:[#allocation7 + $0x3f0] ss:$24 sps:$4 sm:$0xff]   ;;  %v3101_v13 = vld [vmem:[#allocation7 + $0x3c4] ss:$24 sps:$4 sm:$0xff]   ;;  %v3100_v14 = vld [vmem:[#allocation7 + $0xc0] ss:$24 sps:$4 sm:$0xff]  }
  0x48   : > { %v3104_v15 = vld [vmem:[#allocation7 + $0x94] ss:$24 sps:$4 sm:$0xff]   ;;  %v3103_v16 = vld [vmem:[#allocation7 + $0x3c0] ss:$24 sps:$4 sm:$0xff]   ;;  %v3106_v18 = vld [vmem:[#allocation7 + $0x90] ss:$24 sps:$4 sm:$0xff]  }
  0x49   : > { %2034 = vmatpush1.bf16.msra.mxu0 %v3088_v5  ;;  %v3107_v17 = vld [vmem:[#allocation7 + $0x394] ss:$24 sps:$4 sm:$0xff]   ;;  %v3110_v19 = vld [vmem:[#allocation7 + $0x64] ss:$24 sps:$4 sm:$0xff]   ;;  %v3109_v20 = vld [vmem:[#allocation7 + $0x390] ss:$24 sps:$4 sm:$0xff]  }
  0x4a   : > { %2035 = vmatprep.subr.bf16.mxu0 %v3092_v8  ;;  %2077 = vmatpush1.bf16.msra.mxu1 %v3091_v7  ;;  %v3113_v21 = vld [vmem:[#allocation7 + $0x364] ss:$24 sps:$4 sm:$0xff]   ;;  %v3112_v22 = vld [vmem:[#allocation7 + $0x60] ss:$24 sps:$4 sm:$0xff]   ;;  %v3116_v23 = vld [vmem:[#allocation7 + $0x34] ss:$24 sps:$4 sm:$0xff]  }
  0x4b   : > { %2078 = vmatprep.subr.bf16.mxu1 %v3095_v10  ;;  %v3115_v24 = vld [vmem:[#allocation7 + $0x360] ss:$24 sps:$4 sm:$0xff]   ;;  %v3119_v25 = vld [vmem:[#allocation7 + $0x334] ss:$24 sps:$4 sm:$0xff]   ;;  %v3118_v26 = vld [vmem:[#allocation7 + $0x30] ss:$24 sps:$4 sm:$0xff]  }
  0x4c   : > { %v3122_v27 = vld [vmem:[#allocation7 + $0x4] ss:$24 sps:$4 sm:$0xff]   ;;  %v3121_v28 = vld [vmem:[#allocation7 + $0x330] ss:$24 sps:$4 sm:$0xff]   ;;  %v3124_v30 = vld [vmem:[#allocation7] ss:$24 sps:$4 sm:$0xff]  }
  0x4d   : > { %2036 = vmatpush1.bf16.msra.mxu0 %v3094_v9  ;;  %v3125_v29 = vld [vmem:[#allocation7 + $0x304] ss:$24 sps:$4 sm:$0xff]   ;;  %v3128_v31 = vld [vmem:[#allocation7 + $0x2d4] ss:$24 sps:$4 sm:$0xff]   ;;  %v3127_v32 = vld [vmem:[#allocation7 + $0x300] ss:$24 sps:$4 sm:$0xff]  }
  0x4e   : > { %2037 = vmatprep.subr.bf16.mxu0 %v3098_v11  ;;  %2079 = vmatpush1.bf16.msra.mxu1 %v3097_v12  ;;  %v3131_v33 = vld [vmem:[#allocation7 + $0x5d4] ss:$24 sps:$4 sm:$0xff]   ;;  %v3130_v34 = vld [vmem:[#allocation7 + $0x2d0] ss:$24 sps:$4 sm:$0xff]   ;;  %v3134_v35 = vld [vmem:[#allocation7 + $0x2a4] ss:$24 sps:$4 sm:$0xff]  }
  0x4f   : > { %2080 = vmatprep.subr.bf16.mxu1 %v3101_v13  ;;  %v3133_v36 = vld [vmem:[#allocation7 + $0x5d0] ss:$24 sps:$4 sm:$0xff]   ;;  %v3137_v37 = vld [vmem:[#allocation7 + $0x5a4] ss:$24 sps:$4 sm:$0xff]   ;;  %v3136_v38 = vld [vmem:[#allocation7 + $0x2a0] ss:$24 sps:$4 sm:$0xff]  }
  0x50   : > { %v3140_v39 = vld [vmem:[#allocation7 + $0x274] ss:$24 sps:$4 sm:$0xff]   ;;  %v3139_v40 = vld [vmem:[#allocation7 + $0x5a0] ss:$24 sps:$4 sm:$0xff]   ;;  %v3142_v42 = vld [vmem:[#allocation7 + $0x270] ss:$24 sps:$4 sm:$0xff]  }
  0x51   : > { %2038 = vmatpush1.bf16.msra.mxu0 %v3100_v14  ;;  %v3143_v41 = vld [vmem:[#allocation7 + $0x574] ss:$24 sps:$4 sm:$0xff]   ;;  %v3146_v43 = vld [vmem:[#allocation7 + $0x244] ss:$24 sps:$4 sm:$0xff]   ;;  %v3145_v44 = vld [vmem:[#allocation7 + $0x570] ss:$24 sps:$4 sm:$0xff]  }
  0x52   : > { %2039 = vmatprep.subr.bf16.mxu0 %v3104_v15  ;;  %2081 = vmatpush1.bf16.msra.mxu1 %v3103_v16  ;;  %v3149_v45 = vld [vmem:[#allocation7 + $0x544] ss:$24 sps:$4 sm:$0xff]   ;;  %v254_v46 = vld [vmem:[#allocation4 + $0x8] sm:$0xff]  ;;  %v3148_v48 = vld [vmem:[#allocation7 + $0x240] ss:$24 sps:$4 sm:$0xff]   ;;  %vm251_vm0 = vcmask 0  }
  0x53   : > { %2082 = vmatprep.subr.bf16.mxu1 %v3107_v17  ;;  %v260_v47 = vld [vmem:[#allocation4 + $0x38] sm:$0xff]  ;;  %v3152_v50 = vld [vmem:[#allocation7 + $0x214] ss:$24 sps:$4 sm:$0xff]   ;;  %v3154_v56 = vld [vmem:[#allocation7 + $0x210] ss:$24 sps:$4 sm:$0xff]  }
  0x54   : > { %v3770_v49 = vpack.c.bf16 %v260_v47, %v254_v46  ;;  %v3151_v51 = vld [vmem:[#allocation7 + $0x540] ss:$24 sps:$4 sm:$0xff]   ;;  %v262_v53 = vld [vmem:[#allocation4 + $0x48] sm:$0xff]  ;;  %v3158_v57 = vld [vmem:[#allocation7 + $0x1e4] ss:$24 sps:$4 sm:$0xff]  }
  0x55   : > { %2040 = vmatpush1.bf16.msra.mxu0 %v3106_v18  ;;  %v256_v52 = vld [vmem:[#allocation4 + $0x18] sm:$0xff]  ;;  %v3155_v54 = vld [vmem:[#allocation7 + $0x514] ss:$24 sps:$4 sm:$0xff]   ;;  %v3157_v58 = vld [vmem:[#allocation7 + $0x510] ss:$24 sps:$4 sm:$0xff]  }
  0x56   : > { %2041 = vmatprep.subr.bf16.mxu0 %v3110_v19  ;;  %2083 = vmatpush1.bf16.msra.mxu1 %v3109_v20  ;;  %v3773_v55 = vpack.c.bf16 %v262_v53, %v256_v52  ;;  %v3161_v59 = vld [vmem:[#allocation7 + $0x4e4] ss:$24 sps:$4 sm:$0xff]   ;;  %v3160_v60 = vld [vmem:[#allocation7 + $0x1e0] ss:$24 sps:$4 sm:$0xff]   ;;  %v3164_v61 = vld [vmem:[#allocation7 + $0x1b4] ss:$24 sps:$4 sm:$0xff]  }
  0x57   : > { %2084 = vmatprep.subr.bf16.mxu1 %v3113_v21  ;;  %2063 = vmatprep.mubr.bf16.mxu0 %v3770_v49  ;;  %v3163_v62 = vld [vmem:[#allocation7 + $0x4e0] ss:$24 sps:$4 sm:$0xff]   ;;  %v3167_v63 = vld [vmem:[#allocation7 + $0x4b4] ss:$24 sps:$4 sm:$0xff]   ;;  %v3166_v0 = vld [vmem:[#allocation7 + $0x1b0] ss:$24 sps:$4 sm:$0xff]  }
  0x58   : > { %2106 = vmatprep.mubr.bf16.mxu1 %v3773_v55  ;;  %v3169_v1 = vld [vmem:[#allocation7 + $0x4b0] ss:$24 sps:$4 sm:$0xff]   ;;  %v3170_v2 = vld [vmem:[#allocation7 + $0x184] ss:$24 sps:$4 sm:$0xff]   ;;  %v3172_v3 = vld [vmem:[#allocation7 + $0x180] ss:$24 sps:$4 sm:$0xff]  }
  0x59   : > { %2042 = vmatpush1.bf16.msra.mxu0 %v3112_v22  ;;  %v3173_v4 = vld [vmem:[#allocation7 + $0x484] ss:$24 sps:$4 sm:$0xff]   ;;  %v3175_v6 = vld [vmem:[#allocation7 + $0x480] ss:$24 sps:$4 sm:$0xff]   ;;  %v259_v7 = vld [vmem:[#allocation4 + $0x30] sm:$0xff] }
  0x5a   : > { %2043 = vmatprep.subr.bf16.mxu0 %v3116_v23  ;;  %2085 = vmatpush1.bf16.msra.mxu1 %v3115_v24  ;;  %v253_v5 = vld [vmem:[#allocation4] sm:$0xff]  ;;  %v3178_v8 = vld [vmem:[#allocation7 + $0x754] ss:$24 sps:$4 sm:$0xff]   ;;  %v3176_v13 = vld [vmem:[#allocation7 + $0x750] ss:$24 sps:$4 sm:$0xff]  }
  0x5b   : > { %2086 = vmatprep.subr.bf16.mxu1 %v3119_v25  ;;  %v255_v9 = vld [vmem:[#allocation4 + $0x10] sm:$0xff]  ;;  %v261_v10 = vld [vmem:[#allocation4 + $0x40] sm:$0xff]  ;;  %v3776_v11 = vpack.c.bf16 %v259_v7, %v253_v5 }
  0x5c   : > { %v3181_v12 = vld [vmem:[#allocation7 + $0x15c] ss:$24 sps:$4 sm:$0xff]   ;;  %v3778_v14 = vpack.c.bf16 %v261_v10, %v255_v9  ;;  %v3179_v16 = vld [vmem:[#allocation7 + $0x158] ss:$24 sps:$4 sm:$0xff]   ;;  %v3187_v17 = vld [vmem:[#allocation7 + $0x12c] ss:$24 sps:$4 sm:$0xff]  }
  0x5d   : > { %2044 = vmatpush1.bf16.msra.mxu0 %v3118_v26  ;;  %v3184_v15 = vld [vmem:[#allocation7 + $0x724] ss:$24 sps:$4 sm:$0xff]   ;;  %v3182_v18 = vld [vmem:[#allocation7 + $0x720] ss:$24 sps:$4 sm:$0xff]   ;;  %v3190_v19 = vld [vmem:[#allocation7 + $0x6f4] ss:$24 sps:$4 sm:$0xff]  }
  0x5e   : > { %2045 = vmatprep.subr.bf16.mxu0 %v3122_v27  ;;  %2087 = vmatpush1.bf16.msra.mxu1 %v3121_v28  ;;  %v3185_v20 = vld [vmem:[#allocation7 + $0x128] ss:$24 sps:$4 sm:$0xff]   ;;  %v3193_v21 = vld [vmem:[#allocation7 + $0xfc] ss:$24 sps:$4 sm:$0xff]   ;;  %v3191_v24 = vld [vmem:[#allocation7 + $0xf8] ss:$24 sps:$4 sm:$0xff]  }
  0x5f   : > { %2088 = vmatprep.subr.bf16.mxu1 %v3125_v29  ;;  %v3188_v22 = vld [vmem:[#allocation7 + $0x6f0] ss:$24 sps:$4 sm:$0xff]   ;;  %v3196_v23 = vld [vmem:[#allocation7 + $0x6c4] ss:$24 sps:$4 sm:$0xff]   ;;  %v3194_v26 = vld [vmem:[#allocation7 + $0x6c0] ss:$24 sps:$4 sm:$0xff]  }
  0x60   : > { %v3199_v25 = vld [vmem:[#allocation7 + $0xcc] ss:$24 sps:$4 sm:$0xff]   ;;  %v3197_v28 = vld [vmem:[#allocation7 + $0xc8] ss:$24 sps:$4 sm:$0xff]   ;;  %v3205_v29 = vld [vmem:[#allocation7 + $0x9c] ss:$24 sps:$4 sm:$0xff]  }
  0x61   : > { %2046 = vmatpush1.bf16.msra.mxu0 %v3124_v30  ;;  %v3202_v27 = vld [vmem:[#allocation7 + $0x694] ss:$24 sps:$4 sm:$0xff]   ;;  %v3200_v30 = vld [vmem:[#allocation7 + $0x690] ss:$24 sps:$4 sm:$0xff]   ;;  %v3254_v7 = vld [vmem:[#allocation7 + $0x7e0] ss:$24 sps:$4 sm:$0xff]  }
  0x62   : > { %2047 = vmatprep.subr.bf16.mxu0 %v3128_v31  ;;  %2089 = vmatpush1.bf16.msra.mxu1 %v3127_v32  ;;  %v3208_v31 = vld [vmem:[#allocation7 + $0x664] ss:$24 sps:$4 sm:$0xff]   ;;  %v3203_v32 = vld [vmem:[#allocation7 + $0x98] ss:$24 sps:$4 sm:$0xff]   ;;  %v3226_v46 = vld [vmem:[#allocation7 + $0x8d4] ss:$24 sps:$4 sm:$0xff]  }
  0x63   : > { %2090 = vmatprep.subr.bf16.mxu1 %v3131_v33  ;;  %v3211_v33 = vld [vmem:[#allocation7 + $0x6c] ss:$24 sps:$4 sm:$0xff]   ;;  %v3221_v47 = vld [vmem:[#allocation7 + $0x8] ss:$24 sps:$4 sm:$0xff]   ;;  %v3227_v52 = vld [vmem:[#allocation7 + $0x2d8] ss:$24 sps:$4 sm:$0xff]  }
  0x64   : > { %v3235_v53 = vld [vmem:[#allocation7 + $0x2ac] ss:$24 sps:$4 sm:$0xff]   ;;  %v3251_v5 = vld [vmem:[#allocation7 + $0x218] ss:$24 sps:$4 sm:$0xff]   ;;  %v3257_v9 = vld [vmem:[#allocation7 + $0x1e8] ss:$24 sps:$4 sm:$0xff]  }
  0x65   : > { %2048 = vmatpush2.bf16.msra.mxu0 %v3130_v34  ;;  %v3206_v34 = vld [vmem:[#allocation7 + $0x660] ss:$24 sps:$4 sm:$0xff]   ;;  %v3265_v10 = vld [vmem:[#allocation7 + $0x1bc] ss:$24 sps:$4 sm:$0xff]  }
  0x66   : > { %2049 = vmatprep.subr.bf16.mxu0 %v3134_v35  ;;  %2091 = vmatpush2.bf16.msra.mxu1 %v3133_v36  ;;  %v3214_v35 = vld [vmem:[#allocation7 + $0x634] ss:$24 sps:$4 sm:$0xff]   ;;  %v3209_v36 = vld [vmem:[#allocation7 + $0x68] ss:$24 sps:$4 sm:$0xff]  }
  0x67   : > { %2092 = vmatprep.subr.bf16.mxu1 %v3137_v37  ;;  %v3217_v37 = vld [vmem:[#allocation7 + $0x3c] ss:$24 sps:$4 sm:$0xff]  }
  0x69   : > { %2050 = vmatpush2.bf16.msra.mxu0 %v3136_v38  ;;  %v3212_v38 = vld [vmem:[#allocation7 + $0x630] ss:$24 sps:$4 sm:$0xff]  }
  0x6a   : > { %2051 = vmatprep.subr.bf16.mxu0 %v3140_v39  ;;  %2093 = vmatpush2.bf16.msra.mxu1 %v3139_v40  ;;  %v3220_v39 = vld [vmem:[#allocation7 + $0x604] ss:$24 sps:$4 sm:$0xff]   ;;  %v258_v40 = vld [vmem:[#allocation4 + $0x28] sm:$0xff] }
  0x6b   : > { %2094 = vmatprep.subr.bf16.mxu1 %v3143_v41  ;;  %v264_v41 = vld [vmem:[#allocation4 + $0x58] sm:$0xff] }
  0x6d   : > { %2052 = vmatpush2.bf16.msra.mxu0 %v3142_v42  ;;  %v3215_v42 = vld [vmem:[#allocation7 + $0x38] ss:$24 sps:$4 sm:$0xff]  }
  0x6e   : > { %2053 = vmatprep.subr.bf16.mxu0 %v3146_v43  ;;  %2095 = vmatpush2.bf16.msra.mxu1 %v3145_v44  ;;  %v3783_v43 = vpack.c.bf16 %v264_v41, %v258_v40  ;;  %v3223_v44 = vld [vmem:[#allocation7 + $0xc] ss:$24 sps:$4 sm:$0xff]   ;;  %v3296_v40 = vld [vmem:[#allocation7 + $0x398] ss:$24 sps:$4 sm:$0xff]  }
  0x6f   : > { %2096 = vmatprep.subr.bf16.mxu1 %v3149_v45  ;;  %v3218_v45 = vld [vmem:[#allocation7 + $0x600] ss:$24 sps:$4 sm:$0xff]   ;;  %v3304_v41 = vld [vmem:[#allocation7 + $0x36c] ss:$24 sps:$4 sm:$0xff]  }
  0x71   : > { %2054 = vmatpush2.bf16.msra.mxu0 %v3148_v48  ;;  %v3229_v48 = vld [vmem:[#allocation7 + $0x2dc] ss:$24 sps:$4 sm:$0xff]  }
  0x72   : > { %2055 = vmatprep.subr.bf16.mxu0 %v3152_v50  ;;  %2097 = vmatpush2.bf16.msra.mxu1 %v3151_v51  ;;  %v3224_v50 = vld [vmem:[#allocation7 + $0x8d0] ss:$24 sps:$4 sm:$0xff]   ;;  %v3232_v51 = vld [vmem:[#allocation7 + $0x8a4] ss:$24 sps:$4 sm:$0xff]  }
  0x73   : > { %2098 = vmatprep.subr.bf16.mxu1 %v3155_v54  ;;  %v3230_v54 = vld [vmem:[#allocation7 + $0x8a0] ss:$24 sps:$4 sm:$0xff]  }
  0x75   : > { %2056 = vmatpush2.bf16.msra.mxu0 %v3154_v56  ;;  %v3238_v56 = vld [vmem:[#allocation7 + $0x874] ss:$24 sps:$4 sm:$0xff]  }
  0x76   : > { %2057 = vmatprep.subr.bf16.mxu0 %v3158_v57  ;;  %2099 = vmatpush2.bf16.msra.mxu1 %v3157_v58  ;;  %v3233_v57 = vld [vmem:[#allocation7 + $0x2a8] ss:$24 sps:$4 sm:$0xff]   ;;  %v3241_v58 = vld [vmem:[#allocation7 + $0x27c] ss:$24 sps:$4 sm:$0xff]  }
  0x77   : > { %2100 = vmatprep.subr.bf16.mxu1 %v3161_v59  ;;  %v3236_v59 = vld [vmem:[#allocation7 + $0x870] ss:$24 sps:$4 sm:$0xff]  }
  0x79   : > { %2058 = vmatpush2.bf16.msra.mxu0 %v3160_v60  ;;  %v3244_v60 = vld [vmem:[#allocation7 + $0x844] ss:$24 sps:$4 sm:$0xff]  }
  0x7a   : > { %2059 = vmatprep.subr.bf16.mxu0 %v3164_v61  ;;  %2101 = vmatpush2.bf16.msra.mxu1 %v3163_v62  ;;  %v3239_v61 = vld [vmem:[#allocation7 + $0x278] ss:$24 sps:$4 sm:$0xff]   ;;  %v3247_v62 = vld [vmem:[#allocation7 + $0x24c] ss:$24 sps:$4 sm:$0xff]  }
  0x7b   : > { %2102 = vmatprep.subr.bf16.mxu1 %v3167_v63  ;;  %v3242_v63 = vld [vmem:[#allocation7 + $0x840] ss:$24 sps:$4 sm:$0xff]  }
  0x7d   : > { %2060 = vmatpush2.bf16.msra.mxu0 %v3166_v0  ;;  %v3250_v0 = vld [vmem:[#allocation7 + $0x814] ss:$24 sps:$4 sm:$0xff]  }
  0x7e   : > { %2061 = vmatprep.subr.bf16.mxu0 %v3170_v2  ;;  %2103 = vmatpush2.bf16.msra.mxu1 %v3169_v1  ;;  %v3245_v1 = vld [vmem:[#allocation7 + $0x248] ss:$24 sps:$4 sm:$0xff]   ;;  %v3253_v2 = vld [vmem:[#allocation7 + $0x21c] ss:$24 sps:$4 sm:$0xff]  }
  0x7f   : > { %2104 = vmatprep.subr.bf16.mxu1 %v3173_v4  ;;  %v3256_v4 = vld [vmem:[#allocation7 + $0x7e4] ss:$24 sps:$4 sm:$0xff]  }
  0x81   : > { %2062 = vmatpush2.bf16.msra.mxu0 %v3172_v3  ;;  %v3248_v3 = vld [vmem:[#allocation7 + $0x810] ss:$24 sps:$4 sm:$0xff]  }
  0x82   : > { %2117 = vmatprep.subr.bf16.mxu0 %v3178_v8  ;;  %2105 = vmatpush2.bf16.msra.mxu1 %v3175_v6  ;;  %v3259_v6 = vld [vmem:[#allocation7 + $0x1ec] ss:$24 sps:$4 sm:$0xff]  }
  0x83   : > { %2160 = vmatprep.subr.bf16.mxu1 %v3181_v12  ;;  %v3262_v8 = vld [vmem:[#allocation7 + $0x7b4] ss:$24 sps:$4 sm:$0xff]   ;;  %v3260_v12 = vld [vmem:[#allocation7 + $0x7b0] ss:$24 sps:$4 sm:$0xff]  }
  0x84   : > { %2064 = vmatmul.mubr.bf16.vlgmr.msra.gmra.mxu0 %v3776_v11 }
  0x85   : > { %2118 = vmatpush1.bf16.msra.mxu0 %v3176_v13  ;;  %2107 = vmatmul.mubr.bf16.vlgmr.msra.gmra.mxu1 %v3778_v14  ;;  %v3268_v13 = vld [vmem:[#allocation7 + $0x784] ss:$24 sps:$4 sm:$0xff]  }
  0x86   : > { %2119 = vmatprep.subr.bf16.mxu0 %v3184_v15  ;;  %2161 = vmatpush1.bf16.msra.mxu1 %v3179_v16  ;;  %v3263_v15 = vld [vmem:[#allocation7 + $0x1b8] ss:$24 sps:$4 sm:$0xff]  }
  0x87   : > { %2192 = vmatprep.mubr.bf16.mxu1 %v3770_v49  ;;  %2162 = vmatprep.subr.bf16.mxu1 %v3187_v17  ;;  %v3266_v16 = vld [vmem:[#allocation7 + $0x780] ss:$24 sps:$4 sm:$0xff]   ;;  %v3271_v17 = vld [vmem:[#allocation7 + $0x18c] ss:$24 sps:$4 sm:$0xff]  }
  0x88   : > { %2149 = vmatprep.mubr.bf16.mxu0 %v3783_v43 }
  0x89   : > { %2120 = vmatpush1.bf16.msra.mxu0 %v3182_v18  ;;  %v257_v18 = vld [vmem:[#allocation4 + $0x20] sm:$0xff] }
  0x8a   : > { %2121 = vmatprep.subr.bf16.mxu0 %v3190_v19  ;;  %2163 = vmatpush1.bf16.msra.mxu1 %v3185_v20  ;;  %v263_v19 = vld [vmem:[#allocation4 + $0x50] sm:$0xff] }
  0x8b   : > { %2164 = vmatprep.subr.bf16.mxu1 %v3193_v21  ;;  %v3274_v20 = vld [vmem:[#allocation7 + $0x45c] ss:$24 sps:$4 sm:$0xff]   ;;  %v3269_v21 = vld [vmem:[#allocation7 + $0x188] ss:$24 sps:$4 sm:$0xff]  }
  0x8d   : > { %2122 = vmatpush1.bf16.msra.mxu0 %v3188_v22  ;;  %v3786_v22 = vpack.c.bf16 %v263_v19, %v257_v18  ;;  %v3358_v18 = vld [vmem:[#allocation7 + $0x4bc] ss:$24 sps:$4 sm:$0xff]   ;;  %v3353_v19 = vld [vmem:[#allocation7 + $0x7e8] ss:$24 sps:$4 sm:$0xff]  }
  0x8e   : > { %2123 = vmatprep.subr.bf16.mxu0 %v3196_v23  ;;  %2165 = vmatpush1.bf16.msra.mxu1 %v3191_v24  ;;  %v3277_v23 = vld [vmem:[#allocation7 + $0x75c] ss:$24 sps:$4 sm:$0xff]   ;;  %v3272_v24 = vld [vmem:[#allocation7 + $0x458] ss:$24 sps:$4 sm:$0xff]  }
  0x8f   : > { %2166 = vmatprep.subr.bf16.mxu1 %v3199_v25  ;;  %v3280_v25 = vld [vmem:[#allocation7 + $0x42c] ss:$24 sps:$4 sm:$0xff]  }
  0x91   : > { %2124 = vmatpush1.bf16.msra.mxu0 %v3194_v26  ;;  %v3275_v26 = vld [vmem:[#allocation7 + $0x758] ss:$24 sps:$4 sm:$0xff]  }
  0x92   : > { %2125 = vmatprep.subr.bf16.mxu0 %v3202_v27  ;;  %2167 = vmatpush1.bf16.msra.mxu1 %v3197_v28  ;;  %v3283_v27 = vld [vmem:[#allocation7 + $0x72c] ss:$24 sps:$4 sm:$0xff]   ;;  %v3278_v28 = vld [vmem:[#allocation7 + $0x428] ss:$24 sps:$4 sm:$0xff]  }
  0x93   : > { %2168 = vmatprep.subr.bf16.mxu1 %v3205_v29  ;;  %v3286_v29 = vld [vmem:[#allocation7 + $0x3fc] ss:$24 sps:$4 sm:$0xff]  }
  0x95   : > { %2126 = vmatpush1.bf16.msra.mxu0 %v3200_v30  ;;  %v3281_v30 = vld [vmem:[#allocation7 + $0x728] ss:$24 sps:$4 sm:$0xff]  }
  0x96   : > { %2127 = vmatprep.subr.bf16.mxu0 %v3208_v31  ;;  %2169 = vmatpush1.bf16.msra.mxu1 %v3203_v32  ;;  %v3289_v31 = vld [vmem:[#allocation7 + $0x6fc] ss:$24 sps:$4 sm:$0xff]   ;;  %v3284_v32 = vld [vmem:[#allocation7 + $0x3f8] ss:$24 sps:$4 sm:$0xff]  }
  0x97   : > { %2170 = vmatprep.subr.bf16.mxu1 %v3211_v33  ;;  %v3292_v33 = vld [vmem:[#allocation7 + $0x3cc] ss:$24 sps:$4 sm:$0xff]  }
  0x99   : > { %2128 = vmatpush1.bf16.msra.mxu0 %v3206_v34  ;;  %v3287_v34 = vld [vmem:[#allocation7 + $0x6f8] ss:$24 sps:$4 sm:$0xff]  }
  0x9a   : > { %2129 = vmatprep.subr.bf16.mxu0 %v3214_v35  ;;  %2171 = vmatpush1.bf16.msra.mxu1 %v3209_v36  ;;  %v3295_v35 = vld [vmem:[#allocation7 + $0x6cc] ss:$24 sps:$4 sm:$0xff]   ;;  %v3290_v36 = vld [vmem:[#allocation7 + $0x3c8] ss:$24 sps:$4 sm:$0xff]  }
  0x9b   : > { %2172 = vmatprep.subr.bf16.mxu1 %v3217_v37  ;;  %v3298_v37 = vld [vmem:[#allocation7 + $0x39c] ss:$24 sps:$4 sm:$0xff]  }
  0x9d   : > { %2130 = vmatpush1.bf16.msra.mxu0 %v3212_v38  ;;  %v3293_v38 = vld [vmem:[#allocation7 + $0x6c8] ss:$24 sps:$4 sm:$0xff]  }
  0x9e   : > { %2131 = vmatprep.subr.bf16.mxu0 %v3220_v39  ;;  %2173 = vmatpush1.bf16.msra.mxu1 %v3215_v42  ;;  %v3301_v39 = vld [vmem:[#allocation7 + $0x69c] ss:$24 sps:$4 sm:$0xff]   ;;  %v3299_v42 = vld [vmem:[#allocation7 + $0x698] ss:$24 sps:$4 sm:$0xff]  }
  0x9f   : > { %2174 = vmatprep.subr.bf16.mxu1 %v3223_v44  ;;  %v3307_v44 = vld [vmem:[#allocation7 + $0x66c] ss:$24 sps:$4 sm:$0xff]  }
  0xa1   : > { %2132 = vmatpush1.bf16.msra.mxu0 %v3218_v45  ;;  %v3302_v45 = vld [vmem:[#allocation7 + $0x368] ss:$24 sps:$4 sm:$0xff]  }
  0xa2   : > { %2133 = vmatprep.subr.bf16.mxu0 %v3226_v46  ;;  %2175 = vmatpush1.bf16.msra.mxu1 %v3221_v47  ;;  %v3310_v46 = vld [vmem:[#allocation7 + $0x33c] ss:$24 sps:$4 sm:$0xff]   ;;  %v3305_v47 = vld [vmem:[#allocation7 + $0x668] ss:$24 sps:$4 sm:$0xff]  }
  0xa3   : > { %2176 = vmatprep.subr.bf16.mxu1 %v3229_v48  ;;  %v3313_v48 = vld [vmem:[#allocation7 + $0x63c] ss:$24 sps:$4 sm:$0xff]  }
  0xa5   : > { %2134 = vmatpush2.bf16.msra.mxu0 %v3224_v50  ;;  %v3308_v50 = vld [vmem:[#allocation7 + $0x338] ss:$24 sps:$4 sm:$0xff]  }
  0xa6   : > { %2135 = vmatprep.subr.bf16.mxu0 %v3232_v51  ;;  %2177 = vmatpush2.bf16.msra.mxu1 %v3227_v52  ;;  %v3316_v51 = vld [vmem:[#allocation7 + $0x30c] ss:$24 sps:$4 sm:$0xff]   ;;  %v3311_v52 = vld [vmem:[#allocation7 + $0x638] ss:$24 sps:$4 sm:$0xff]  }
  0xa7   : > { %2178 = vmatprep.subr.bf16.mxu1 %v3235_v53  ;;  %v3319_v53 = vld [vmem:[#allocation7 + $0x60c] ss:$24 sps:$4 sm:$0xff]  }
  0xa9   : > { %2136 = vmatpush2.bf16.msra.mxu0 %v3230_v54  ;;  %v3314_v54 = vld [vmem:[#allocation7 + $0x308] ss:$24 sps:$4 sm:$0xff]  }
  0xaa   : > { %2137 = vmatprep.subr.bf16.mxu0 %v3238_v56  ;;  %2179 = vmatpush2.bf16.msra.mxu1 %v3233_v57  ;;  %v3322_v56 = vld [vmem:[#allocation7 + $0x5dc] ss:$24 sps:$4 sm:$0xff]   ;;  %v3317_v57 = vld [vmem:[#allocation7 + $0x608] ss:$24 sps:$4 sm:$0xff]  }
  0xab   : > { %2180 = vmatprep.subr.bf16.mxu1 %v3241_v58  ;;  %v3325_v58 = vld [vmem:[#allocation7 + $0x8dc] ss:$24 sps:$4 sm:$0xff]  }
  0xad   : > { %2138 = vmatpush2.bf16.msra.mxu0 %v3236_v59  ;;  %v3320_v59 = vld [vmem:[#allocation7 + $0x5d8] ss:$24 sps:$4 sm:$0xff]  }
  0xae   : > { %2139 = vmatprep.subr.bf16.mxu0 %v3244_v60  ;;  %2181 = vmatpush2.bf16.msra.mxu1 %v3239_v61  ;;  %v3328_v60 = vld [vmem:[#allocation7 + $0x5ac] ss:$24 sps:$4 sm:$0xff]   ;;  %v3323_v61 = vld [vmem:[#allocation7 + $0x8d8] ss:$24 sps:$4 sm:$0xff]  }
  0xaf   : > { %2182 = vmatprep.subr.bf16.mxu1 %v3247_v62  ;;  %v3331_v62 = vld [vmem:[#allocation7 + $0x8ac] ss:$24 sps:$4 sm:$0xff]  }
  0xb1   : > { %2140 = vmatpush2.bf16.msra.mxu0 %v3242_v63  ;;  %v3326_v63 = vld [vmem:[#allocation7 + $0x5a8] ss:$24 sps:$4 sm:$0xff]  }
  0xb2   : > { %2141 = vmatprep.subr.bf16.mxu0 %v3250_v0  ;;  %2183 = vmatpush2.bf16.msra.mxu1 %v3245_v1  ;;  %v3334_v0 = vld [vmem:[#allocation7 + $0x57c] ss:$24 sps:$4 sm:$0xff]   ;;  %v3329_v1 = vld [vmem:[#allocation7 + $0x8a8] ss:$24 sps:$4 sm:$0xff]  }
  0xb3   : > { %2184 = vmatprep.subr.bf16.mxu1 %v3253_v2  ;;  %v3337_v2 = vld [vmem:[#allocation7 + $0x87c] ss:$24 sps:$4 sm:$0xff]  }
  0xb5   : > { %2142 = vmatpush2.bf16.msra.mxu0 %v3248_v3  ;;  %v3332_v3 = vld [vmem:[#allocation7 + $0x578] ss:$24 sps:$4 sm:$0xff]  }
  0xb6   : > { %2143 = vmatprep.subr.bf16.mxu0 %v3256_v4  ;;  %2185 = vmatpush2.bf16.msra.mxu1 %v3251_v5  ;;  %v3340_v4 = vld [vmem:[#allocation7 + $0x54c] ss:$24 sps:$4 sm:$0xff]   ;;  %v3335_v5 = vld [vmem:[#allocation7 + $0x878] ss:$24 sps:$4 sm:$0xff]  }
  0xb7   : > { %2186 = vmatprep.subr.bf16.mxu1 %v3259_v6  ;;  %v3343_v6 = vld [vmem:[#allocation7 + $0x84c] ss:$24 sps:$4 sm:$0xff]  }
  0xb9   : > { %2144 = vmatpush2.bf16.msra.mxu0 %v3254_v7  ;;  %v3338_v7 = vld [vmem:[#allocation7 + $0x548] ss:$24 sps:$4 sm:$0xff]  }
  0xba   : > { %2145 = vmatprep.subr.bf16.mxu0 %v3262_v8  ;;  %2187 = vmatpush2.bf16.msra.mxu1 %v3257_v9  ;;  %v3346_v8 = vld [vmem:[#allocation7 + $0x51c] ss:$24 sps:$4 sm:$0xff]   ;;  %v3341_v9 = vld [vmem:[#allocation7 + $0x848] ss:$24 sps:$4 sm:$0xff]  }
  0xbb   : > { %2188 = vmatprep.subr.bf16.mxu1 %v3265_v10  ;;  %v3349_v10 = vld [vmem:[#allocation7 + $0x81c] ss:$24 sps:$4 sm:$0xff]  }
  0xbd   : > { %2146 = vmatpush2.bf16.msra.mxu0 %v3260_v12  ;;  %v3344_v12 = vld [vmem:[#allocation7 + $0x518] ss:$24 sps:$4 sm:$0xff]  }
  0xbe   : > { %2147 = vmatprep.subr.bf16.mxu0 %v3268_v13  ;;  %2189 = vmatpush2.bf16.msra.mxu1 %v3263_v15  ;;  %v3352_v13 = vld [vmem:[#allocation7 + $0x4ec] ss:$24 sps:$4 sm:$0xff]   ;;  %v3347_v15 = vld [vmem:[#allocation7 + $0x818] ss:$24 sps:$4 sm:$0xff]  }
  0xbf   : > { %2190 = vmatprep.subr.bf16.mxu1 %v3271_v17  ;;  %v3350_v17 = vld [vmem:[#allocation7 + $0x4e8] ss:$24 sps:$4 sm:$0xff]  }
  0xc1   : > { %2148 = vmatpush2.bf16.msra.mxu0 %v3266_v16  ;;  %v3355_v16 = vld [vmem:[#allocation7 + $0x7ec] ss:$24 sps:$4 sm:$0xff]  }
  0xc2   : > { %2203 = vmatprep.subr.bf16.mxu0 %v3274_v20  ;;  %2191 = vmatpush2.bf16.msra.mxu1 %v3269_v21  ;;  %v3361_v20 = vld [vmem:[#allocation7 + $0x7bc] ss:$24 sps:$4 sm:$0xff]   ;;  %v3356_v21 = vld [vmem:[#allocation7 + $0x4b8] ss:$24 sps:$4 sm:$0xff]  }
  0xc3   : > { %2246 = vmatprep.subr.bf16.mxu1 %v3277_v23  ;;  %v3364_v23 = vld [vmem:[#allocation7 + $0x48c] ss:$24 sps:$4 sm:$0xff]  }
  0xc4   : > { %2150 = vmatmul.mubr.bf16.vlgmr.msra.gmra.mxu0 %v3786_v22 }
  0xc5   : > { %2204 = vmatpush1.bf16.msra.mxu0 %v3272_v24  ;;  %2235 = vmatprep.mubr.bf16.mxu0 %v3773_v55  ;;  %v3359_v24 = vld [vmem:[#allocation7 + $0x7b8] ss:$24 sps:$4 sm:$0xff]  }
  0xc6   : > { %2193 = vmatmul.mubr.bf16.vlgmr.msra.gmra.mxu1 %v3776_v11  ;;  %2205 = vmatprep.subr.bf16.mxu0 %v3280_v25  ;;  %v3367_v25 = vld [vmem:[#allocation7 + $0x78c] ss:$24 sps:$4 sm:$0xff]  }
  0xc7   : > { %2247 = vmatpush1.bf16.msra.mxu1 %v3275_v26  ;;  %2278 = vmatprep.mubr.bf16.mxu1 %v3783_v43  ;;  %v3362_v26 = vld [vmem:[#allocation7 + $0x488] ss:$24 sps:$4 sm:$0xff]  }
  0xc8   : > { %2248 = vmatprep.subr.bf16.mxu1 %v3283_v27  ;;  %v3370_v27 = vld [vmem:[#allocation7 + $0x164] ss:$24 sps:$4 sm:$0xff]  }
  0xc9   : > { %2206 = vmatpush1.bf16.msra.mxu0 %v3278_v28  ;;  %v3365_v28 = vld [vmem:[#allocation7 + $0x788] ss:$24 sps:$4 sm:$0xff]  }
  0xca   : > { %2207 = vmatprep.subr.bf16.mxu0 %v3286_v29  ;;  %v3373_v29 = vld [vmem:[#allocation7 + $0x464] ss:$24 sps:$4 sm:$0xff]  }
  0xcb   : > { %2249 = vmatpush1.bf16.msra.mxu1 %v3281_v30  ;;  %v3368_v30 = vld [vmem:[#allocation7 + $0x160] ss:$24 sps:$4 sm:$0xff]  }
  0xcc   : > { %2250 = vmatprep.subr.bf16.mxu1 %v3289_v31  ;;  %v3376_v31 = vld [vmem:[#allocation7 + $0x134] ss:$24 sps:$4 sm:$0xff]  }
  0xcd   : > { %2208 = vmatpush1.bf16.msra.mxu0 %v3284_v32  ;;  %v3371_v32 = vld [vmem:[#allocation7 + $0x460] ss:$24 sps:$4 sm:$0xff]  }
  0xce   : > { %2209 = vmatprep.subr.bf16.mxu0 %v3292_v33  ;;  %v3379_v33 = vld [vmem:[#allocation7 + $0x434] ss:$24 sps:$4 sm:$0xff]  }
  0xcf   : > { %2251 = vmatpush1.bf16.msra.mxu1 %v3287_v34  ;;  %v3374_v34 = vld [vmem:[#allocation7 + $0x130] ss:$24 sps:$4 sm:$0xff]  }
  0xd0   : > { %2252 = vmatprep.subr.bf16.mxu1 %v3295_v35  ;;  %v3382_v35 = vld [vmem:[#allocation7 + $0x104] ss:$24 sps:$4 sm:$0xff]  }
  0xd1   : > { %2210 = vmatpush1.bf16.msra.mxu0 %v3290_v36  ;;  %v3377_v36 = vld [vmem:[#allocation7 + $0x430] ss:$24 sps:$4 sm:$0xff]  }
  0xd2   : > { %2211 = vmatprep.subr.bf16.mxu0 %v3298_v37  ;;  %v3385_v37 = vld [vmem:[#allocation7 + $0x404] ss:$24 sps:$4 sm:$0xff]  }
  0xd3   : > { %2253 = vmatpush1.bf16.msra.mxu1 %v3293_v38  ;;  %v3380_v38 = vld [vmem:[#allocation7 + $0x100] ss:$24 sps:$4 sm:$0xff]  }
  0xd4   : > { %2254 = vmatprep.subr.bf16.mxu1 %v3301_v39  ;;  %v3388_v39 = vld [vmem:[#allocation7 + $0xd4] ss:$24 sps:$4 sm:$0xff]  }
  0xd5   : > { %2212 = vmatpush1.bf16.msra.mxu0 %v3296_v40  ;;  %v3383_v40 = vld [vmem:[#allocation7 + $0x400] ss:$24 sps:$4 sm:$0xff]  }
  0xd6   : > { %2213 = vmatprep.subr.bf16.mxu0 %v3304_v41  ;;  %v3391_v41 = vld [vmem:[#allocation7 + $0x3d4] ss:$24 sps:$4 sm:$0xff]  }
  0xd7   : > { %2255 = vmatpush1.bf16.msra.mxu1 %v3299_v42  ;;  %v3394_v42 = vld [vmem:[#allocation7 + $0xa4] ss:$24 sps:$4 sm:$0xff]  }
  0xd8   : > { %2256 = vmatprep.subr.bf16.mxu1 %v3307_v44  ;;  %v3389_v44 = vld [vmem:[#allocation7 + $0x3d0] ss:$24 sps:$4 sm:$0xff]  }
  0xd9   : > { %2214 = vmatpush1.bf16.msra.mxu0 %v3302_v45  ;;  %v3397_v45 = vld [vmem:[#allocation7 + $0x3a4] ss:$24 sps:$4 sm:$0xff]  }
  0xda   : > { %2215 = vmatprep.subr.bf16.mxu0 %v3310_v46  ;;  %v3400_v46 = vld [vmem:[#allocation7 + $0x74] ss:$24 sps:$4 sm:$0xff]  }
  0xdb   : > { %2257 = vmatpush1.bf16.msra.mxu1 %v3305_v47  ;;  %v3395_v47 = vld [vmem:[#allocation7 + $0x3a0] ss:$24 sps:$4 sm:$0xff]  }
  0xdc   : > { %2258 = vmatprep.subr.bf16.mxu1 %v3313_v48  ;;  %v3403_v48 = vld [vmem:[#allocation7 + $0x374] ss:$24 sps:$4 sm:$0xff]  }
  0xdd   : > { %2216 = vmatpush1.bf16.msra.mxu0 %v3308_v50  ;;  %v3398_v50 = vld [vmem:[#allocation7 + $0x70] ss:$24 sps:$4 sm:$0xff]  }
  0xde   : > { %2217 = vmatprep.subr.bf16.mxu0 %v3316_v51  ;;  %v3406_v51 = vld [vmem:[#allocation7 + $0x44] ss:$24 sps:$4 sm:$0xff]  }
  0xdf   : > { %2259 = vmatpush1.bf16.msra.mxu1 %v3311_v52  ;;  %v3401_v52 = vld [vmem:[#allocation7 + $0x370] ss:$24 sps:$4 sm:$0xff]  }
  0xe0   : > { %2260 = vmatprep.subr.bf16.mxu1 %v3319_v53  ;;  %v3409_v53 = vld [vmem:[#allocation7 + $0x344] ss:$24 sps:$4 sm:$0xff]  }
  0xe1   : > { %2218 = vmatpush1.bf16.msra.mxu0 %v3314_v54  ;;  %v3404_v54 = vld [vmem:[#allocation7 + $0x40] ss:$24 sps:$4 sm:$0xff]  }
  0xe2   : > { %2219 = vmatprep.subr.bf16.mxu0 %v3322_v56  ;;  %v3412_v56 = vld [vmem:[#allocation7 + $0x14] ss:$24 sps:$4 sm:$0xff]  }
  0xe3   : > { %2261 = vmatpush1.bf16.msra.mxu1 %v3317_v57  ;;  %v3407_v57 = vld [vmem:[#allocation7 + $0x340] ss:$24 sps:$4 sm:$0xff]  }
  0xe4   : > { %2262 = vmatprep.subr.bf16.mxu1 %v3325_v58  ;;  %v3415_v58 = vld [vmem:[#allocation7 + $0x314] ss:$24 sps:$4 sm:$0xff]  }
  0xe5   : > { %2220 = vmatpush2.bf16.msra.mxu0 %v3320_v59  ;;  %v3410_v59 = vld [vmem:[#allocation7 + $0x10] ss:$24 sps:$4 sm:$0xff]  }
  0xe6   : > { %2221 = vmatprep.subr.bf16.mxu0 %v3328_v60  ;;  %v3418_v60 = vld [vmem:[#allocation7 + $0x2e4] ss:$24 sps:$4 sm:$0xff]  }
  0xe7   : > { %2263 = vmatpush2.bf16.msra.mxu1 %v3323_v61  ;;  %v3413_v61 = vld [vmem:[#allocation7 + $0x310] ss:$24 sps:$4 sm:$0xff]  }
  0xe8   : > { %2264 = vmatprep.subr.bf16.mxu1 %v3331_v62  ;;  %v3421_v62 = vld [vmem:[#allocation7 + $0x5e4] ss:$24 sps:$4 sm:$0xff]  }
  0xe9   : > { %2222 = vmatpush2.bf16.msra.mxu0 %v3326_v63  ;;  %v3416_v63 = vld [vmem:[#allocation7 + $0x2e0] ss:$24 sps:$4 sm:$0xff]  }
  0xea   : > { %2223 = vmatprep.subr.bf16.mxu0 %v3334_v0  ;;  %v3424_v0 = vld [vmem:[#allocation7 + $0x2b4] ss:$24 sps:$4 sm:$0xff]  }
  0xeb   : > { %2265 = vmatpush2.bf16.msra.mxu1 %v3329_v1  ;;  %v3419_v1 = vld [vmem:[#allocation7 + $0x5e0] ss:$24 sps:$4 sm:$0xff]  }
  0xec   : > { %2266 = vmatprep.subr.bf16.mxu1 %v3337_v2  ;;  %v3427_v2 = vld [vmem:[#allocation7 + $0x5b4] ss:$24 sps:$4 sm:$0xff]  }
  0xed   : > { %2224 = vmatpush2.bf16.msra.mxu0 %v3332_v3  ;;  %v3422_v3 = vld [vmem:[#allocation7 + $0x2b0] ss:$24 sps:$4 sm:$0xff]  }
  0xee   : > { %2225 = vmatprep.subr.bf16.mxu0 %v3340_v4  ;;  %v3430_v4 = vld [vmem:[#allocation7 + $0x284] ss:$24 sps:$4 sm:$0xff]  }
  0xef   : > { %2267 = vmatpush2.bf16.msra.mxu1 %v3335_v5  ;;  %v3425_v5 = vld [vmem:[#allocation7 + $0x5b0] ss:$24 sps:$4 sm:$0xff]  }
  0xf0   : > { %2268 = vmatprep.subr.bf16.mxu1 %v3343_v6  ;;  %v3433_v6 = vld [vmem:[#allocation7 + $0x584] ss:$24 sps:$4 sm:$0xff]  }
  0xf1   : > { %2226 = vmatpush2.bf16.msra.mxu0 %v3338_v7  ;;  %v3428_v7 = vld [vmem:[#allocation7 + $0x280] ss:$24 sps:$4 sm:$0xff]  }
  0xf2   : > { %2227 = vmatprep.subr.bf16.mxu0 %v3346_v8  ;;  %v3436_v8 = vld [vmem:[#allocation7 + $0x254] ss:$24 sps:$4 sm:$0xff]  }
  0xf3   : > { %2269 = vmatpush2.bf16.msra.mxu1 %v3341_v9  ;;  %v3431_v9 = vld [vmem:[#allocation7 + $0x580] ss:$24 sps:$4 sm:$0xff]  }
  0xf4   : > { %2270 = vmatprep.subr.bf16.mxu1 %v3349_v10  ;;  %v3439_v10 = vld [vmem:[#allocation7 + $0x554] ss:$24 sps:$4 sm:$0xff]  }
  0xf5   : > { %2228 = vmatpush2.bf16.msra.mxu0 %v3344_v12  ;;  %v3434_v12 = vld [vmem:[#allocation7 + $0x250] ss:$24 sps:$4 sm:$0xff]  }
  0xf6   : > { %2229 = vmatprep.subr.bf16.mxu0 %v3352_v13  ;;  %v3442_v13 = vld [vmem:[#allocation7 + $0x224] ss:$24 sps:$4 sm:$0xff]  }
  0xf7   : > { %2271 = vmatpush2.bf16.msra.mxu1 %v3347_v15  ;;  %v3437_v15 = vld [vmem:[#allocation7 + $0x550] ss:$24 sps:$4 sm:$0xff]  }
  0xf8   : > { %2272 = vmatprep.subr.bf16.mxu1 %v3355_v16  ;;  %v3445_v16 = vld [vmem:[#allocation7 + $0x524] ss:$24 sps:$4 sm:$0xff]  }
  0xf9   : > { %2230 = vmatpush2.bf16.msra.mxu0 %v3350_v17  ;;  %v3440_v17 = vld [vmem:[#allocation7 + $0x220] ss:$24 sps:$4 sm:$0xff]  }
  0xfa   : > { %2231 = vmatprep.subr.bf16.mxu0 %v3358_v18  ;;  %v3448_v18 = vld [vmem:[#allocation7 + $0x1f4] ss:$24 sps:$4 sm:$0xff]  }
  0xfb   : > { %2273 = vmatpush2.bf16.msra.mxu1 %v3353_v19  ;;  %v3443_v19 = vld [vmem:[#allocation7 + $0x520] ss:$24 sps:$4 sm:$0xff]  }
  0xfc   : > { %2274 = vmatprep.subr.bf16.mxu1 %v3361_v20  ;;  %v3451_v20 = vld [vmem:[#allocation7 + $0x4f4] ss:$24 sps:$4 sm:$0xff]  }
  0xfd   : > { %2232 = vmatpush2.bf16.msra.mxu0 %v3356_v21  ;;  %v3446_v21 = vld [vmem:[#allocation7 + $0x1f0] ss:$24 sps:$4 sm:$0xff]  }
  0xfe   : > { %2233 = vmatprep.subr.bf16.mxu0 %v3364_v23  ;;  %v3454_v23 = vld [vmem:[#allocation7 + $0x1c4] ss:$24 sps:$4 sm:$0xff]  }
  0xff   : > { %2275 = vmatpush2.bf16.msra.mxu1 %v3359_v24  ;;  %v3449_v24 = vld [vmem:[#allocation7 + $0x4f0] ss:$24 sps:$4 sm:$0xff]  }
 0x100   : > { %2276 = vmatprep.subr.bf16.mxu1 %v3367_v25  ;;  %v3457_v25 = vld [vmem:[#allocation7 + $0x4c4] ss:$24 sps:$4 sm:$0xff]  }
 0x101   : > { %2234 = vmatpush2.bf16.msra.mxu0 %v3362_v26  ;;  %v3452_v26 = vld [vmem:[#allocation7 + $0x1c0] ss:$24 sps:$4 sm:$0xff]  }
 0x102   : > { %2289 = vmatprep.subr.bf16.mxu0 %v3370_v27  ;;  %v3460_v27 = vld [vmem:[#allocation7 + $0x194] ss:$24 sps:$4 sm:$0xff]  }
 0x103   : > { %2277 = vmatpush2.bf16.msra.mxu1 %v3365_v28  ;;  %v3455_v28 = vld [vmem:[#allocation7 + $0x4c0] ss:$24 sps:$4 sm:$0xff]  }
 0x104   : > { %2236 = vmatmul.mubr.bf16.vlgmr.msra.gmra.mxu0 %v3778_v14  ;;  %2332 = vmatprep.subr.bf16.mxu1 %v3373_v29  ;;  %v3463_v29 = vld [vmem:[#allocation7 + $0x494] ss:$24 sps:$4 sm:$0xff]  }
 0x105   : > { %2290 = vmatpush1.bf16.msra.mxu0 %v3368_v30  ;;  %2321 = vmatprep.mubr.bf16.mxu0 %v3770_v49  ;;  %v3386_v49 = vld [vmem:[#allocation7 + $0xd0] ss:$24 sps:$4 sm:$0xff]  }
 0x106   : > { %2279 = vmatmul.mubr.bf16.vlgmr.msra.gmra.mxu1 %v3786_v22  ;;  %2291 = vmatprep.subr.bf16.mxu0 %v3376_v31  ;;  %v3458_v30 = vld [vmem:[#allocation7 + $0x190] ss:$24 sps:$4 sm:$0xff]   ;;  %v3466_v31 = vld [vmem:[#allocation7 + $0x764] ss:$24 sps:$4 sm:$0xff]  }
 0x107   : > { %2333 = vmatpush1.bf16.msra.mxu1 %v3371_v32  ;;  %2364 = vmatprep.mubr.bf16.mxu1 %v3773_v55  ;;  %v3392_v55 = vld [vmem:[#allocation7 + $0xa0] ss:$24 sps:$4 sm:$0xff]   ;;  %v3461_v32 = vld [vmem:[#allocation7 + $0x490] ss:$24 sps:$4 sm:$0xff]  }
 0x108   : > { %2334 = vmatprep.subr.bf16.mxu1 %v3379_v33  ;;  %v3464_v33 = vld [vmem:[#allocation7 + $0x760] ss:$24 sps:$4 sm:$0xff]  }
 0x109   : > { %2292 = vmatpush1.bf16.msra.mxu0 %v3374_v34  ;;  %v3469_v34 = vld [vmem:[#allocation7 + $0x734] ss:$24 sps:$4 sm:$0xff]  }
 0x10a   : > { %2293 = vmatprep.subr.bf16.mxu0 %v3382_v35  ;;  %v3467_v35 = vld [vmem:[#allocation7 + $0x730] ss:$24 sps:$4 sm:$0xff]  }
 0x10b   : > { %2335 = vmatpush1.bf16.msra.mxu1 %v3377_v36  ;;  %v3472_v36 = vld [vmem:[#allocation7 + $0x704] ss:$24 sps:$4 sm:$0xff]  }
 0x10c   : > { %2336 = vmatprep.subr.bf16.mxu1 %v3385_v37  ;;  %v3470_v37 = vld [vmem:[#allocation7 + $0x700] ss:$24 sps:$4 sm:$0xff]  }
 0x10d   : > { %2294 = vmatpush1.bf16.msra.mxu0 %v3380_v38  ;;  %v3475_v38 = vld [vmem:[#allocation7 + $0x6d4] ss:$24 sps:$4 sm:$0xff]  }
 0x10e   : > { %2295 = vmatprep.subr.bf16.mxu0 %v3388_v39  ;;  %v3473_v39 = vld [vmem:[#allocation7 + $0x6d0] ss:$24 sps:$4 sm:$0xff]  }
 0x10f   : > { %2337 = vmatpush1.bf16.msra.mxu1 %v3383_v40  ;;  %v3478_v40 = vld [vmem:[#allocation7 + $0x6a4] ss:$24 sps:$4 sm:$0xff]  }
 0x110   : > { %2338 = vmatprep.subr.bf16.mxu1 %v3391_v41  ;;  %v3476_v41 = vld [vmem:[#allocation7 + $0x6a0] ss:$24 sps:$4 sm:$0xff]  }
 0x111   : > { %2296 = vmatpush1.bf16.msra.mxu0 %v3386_v49  ;;  %v3479_v49 = vld [vmem:[#allocation7 + $0x670] ss:$24 sps:$4 sm:$0xff]  }
 0x112   : > { %2297 = vmatprep.subr.bf16.mxu0 %v3394_v42  ;;  %v3487_v42 = vld [vmem:[#allocation7 + $0x614] ss:$24 sps:$4 sm:$0xff]  }
 0x113   : > { %2339 = vmatpush1.bf16.msra.mxu1 %v3389_v44  ;;  %v3485_v44 = vld [vmem:[#allocation7 + $0x610] ss:$24 sps:$4 sm:$0xff]  }
 0x114   : > { %2340 = vmatprep.subr.bf16.mxu1 %v3397_v45  ;;  %v3490_v45 = vld [vmem:[#allocation7 + $0x8e4] ss:$24 sps:$4 sm:$0xff]  }
 0x115   : > { %2298 = vmatpush1.bf16.msra.mxu0 %v3392_v55  ;;  %v3488_v55 = vld [vmem:[#allocation7 + $0x8e0] ss:$24 sps:$4 sm:$0xff]  }
 0x116   : > { %2299 = vmatprep.subr.bf16.mxu0 %v3400_v46  ;;  %v3493_v46 = vld [vmem:[#allocation7 + $0x8b4] ss:$24 sps:$4 sm:$0xff]  }
 0x117   : > { %2341 = vmatpush1.bf16.msra.mxu1 %v3395_v47  ;;  %v3491_v47 = vld [vmem:[#allocation7 + $0x8b0] ss:$24 sps:$4 sm:$0xff]  }
 0x118   : > { %2342 = vmatprep.subr.bf16.mxu1 %v3403_v48  ;;  %v3496_v48 = vld [vmem:[#allocation7 + $0x884] ss:$24 sps:$4 sm:$0xff]  }
 0x119   : > { %2300 = vmatpush1.bf16.msra.mxu0 %v3398_v50  ;;  %v3494_v50 = vld [vmem:[#allocation7 + $0x880] ss:$24 sps:$4 sm:$0xff]  }
 0x11a   : > { %2301 = vmatprep.subr.bf16.mxu0 %v3406_v51  ;;  %v3499_v51 = vld [vmem:[#allocation7 + $0x854] ss:$24 sps:$4 sm:$0xff]  }
 0x11b   : > { %2343 = vmatpush1.bf16.msra.mxu1 %v3401_v52  ;;  %v3497_v52 = vld [vmem:[#allocation7 + $0x850] ss:$24 sps:$4 sm:$0xff]  }
 0x11c   : > { %2344 = vmatprep.subr.bf16.mxu1 %v3409_v53  ;;  %v3502_v53 = vld [vmem:[#allocation7 + $0x824] ss:$24 sps:$4 sm:$0xff]  }
 0x11d   : > { %2302 = vmatpush1.bf16.msra.mxu0 %v3404_v54  ;;  %v561_v54 = vlaneseq }
 0x11e   : > { %2303 = vmatprep.subr.bf16.mxu0 %v3412_v56  ;;  %v3500_v56 = vld [vmem:[#allocation7 + $0x820] ss:$24 sps:$4 sm:$0xff]  }
 0x11f   : > { %2345 = vmatpush1.bf16.msra.mxu1 %v3407_v57  ;;  %v3505_v57 = vld [vmem:[#allocation7 + $0x7f4] ss:$24 sps:$4 sm:$0xff]  }
 0x120   : > { %2346 = vmatprep.subr.bf16.mxu1 %v3415_v58  ;;  %v3799_v58 = vshrl.u32 %v561_v54, 7 }
 0x121   : > { %2304 = vmatpush1.bf16.msra.mxu0 %v3410_v59  ;;  %v3503_v59 = vld [vmem:[#allocation7 + $0x7f0] ss:$24 sps:$4 sm:$0xff]  }
 0x122   : > { %2305 = vmatprep.subr.bf16.mxu0 %v3418_v60 }
 0x123   : > { %2347 = vmatpush1.bf16.msra.mxu1 %v3413_v61  ;;  %v3508_v61 = vld [vmem:[#allocation7 + $0x7c4] ss:$24 sps:$4 sm:$0xff]  }
 0x124   : > { %2348 = vmatprep.subr.bf16.mxu1 %v3421_v62  ;;  %v563_v62 = vsub.s32 0, %v3799_v58 }
 0x125   : > { %2306 = vmatpush2.bf16.msra.mxu0 %v3416_v63  ;;  %v3802_v63 = vld [vmem:[#allocation9] sm:$0x3f] }
 0x126   : > { %2307 = vmatprep.subr.bf16.mxu0 %v3424_v0  ;;  %v567_v0 = vsub.s32 1, %v3799_v58 }
 0x127   : > { %2349 = vmatpush2.bf16.msra.mxu1 %v3419_v1  ;;  %v3506_v1 = vld [vmem:[#allocation7 + $0x7c0] ss:$24 sps:$4 sm:$0xff]  }
 0x128   : > { %2350 = vmatprep.subr.bf16.mxu1 %v3427_v2 }
 0x129   : > { %2308 = vmatpush2.bf16.msra.mxu0 %v3422_v3 }
 0x12a   : > { %2309 = vmatprep.subr.bf16.mxu0 %v3430_v4  ;;  %v3511_v4 = vld [vmem:[#allocation7 + $0x794] ss:$24 sps:$4 sm:$0xff]  }
 0x12b   : > { %2351 = vmatpush2.bf16.msra.mxu1 %v3425_v5  ;;  %v564_v5 = vrot.slane %v3802_v63, %v563_v62 }
 0x12c   : > { %2352 = vmatprep.subr.bf16.mxu1 %v3433_v6  ;;  %v568_v6 = vrot.slane %v3802_v63, %v567_v0 }
 0x12d   : > { %2310 = vmatpush2.bf16.msra.mxu0 %v3428_v7  ;;  %v3509_v7 = vld [vmem:[#allocation7 + $0x790] ss:$24 sps:$4 sm:$0xff]  }
 0x12e   : > { %2311 = vmatprep.subr.bf16.mxu0 %v3436_v8 }
 0x12f   : > { %2353 = vmatpush2.bf16.msra.mxu1 %v3431_v9 }
 0x130   : > { %2354 = vmatprep.subr.bf16.mxu1 %v3439_v10 }
 0x131   : > { %2312 = vmatpush2.bf16.msra.mxu0 %v3434_v12 }
 0x132   : > { %2313 = vmatprep.subr.bf16.mxu0 %v3442_v13 }
 0x133   : > { %2355 = vmatpush2.bf16.msra.mxu1 %v3437_v15 }
 0x134   : > { %2356 = vmatprep.subr.bf16.mxu1 %v3445_v16 }
 0x135   : > { %2314 = vmatpush2.bf16.msra.mxu0 %v3440_v17 }
 0x136   : > { %2315 = vmatprep.subr.bf16.mxu0 %v3448_v18 }
 0x137   : > { %2357 = vmatpush2.bf16.msra.mxu1 %v3443_v19 }
 0x138   : > { %2358 = vmatprep.subr.bf16.mxu1 %v3451_v20 }
 0x139   : > { %2316 = vmatpush2.bf16.msra.mxu0 %v3446_v21 }
 0x13a   : > { %2317 = vmatprep.subr.bf16.mxu0 %v3454_v23 }
 0x13b   : > { %2359 = vmatpush2.bf16.msra.mxu1 %v3449_v24 }
 0x13c   : > { %2360 = vmatprep.subr.bf16.mxu1 %v3457_v25 }
 0x13d   : > { %2318 = vmatpush2.bf16.msra.mxu0 %v3452_v26 }
 0x13e   : > { %2319 = vmatprep.subr.bf16.mxu0 %v3460_v27 }
 0x13f   : > { %2361 = vmatpush2.bf16.msra.mxu1 %v3455_v28 }
 0x140   : > { %2362 = vmatprep.subr.bf16.mxu1 %v3463_v29 }
 0x141   : > { %2320 = vmatpush2.bf16.msra.mxu0 %v3458_v30 }
 0x142   : > { %2375 = vmatprep.subr.bf16.mxu0 %v3466_v31 }
 0x143   : > { %2363 = vmatpush2.bf16.msra.mxu1 %v3461_v32 }
 0x144   : > { %2322 = vmatmul.mubr.bf16.vlgmr.msra.gmra.mxu0 %v3776_v11  ;;  %v3481_v11 = vld [vmem:[#allocation7 + $0x674] ss:$24 sps:$4 sm:$0xff]   ;;  %v2065_v60 = vpop.f32.mrf.mxu0 }
 0x145   : > { %2376 = vmatpush1.bf16.msra.mxu0 %v3464_v33  ;;  %2407 = vmatprep.mubr.bf16.mxu0 %v3783_v43  ;;  %v3484_v43 = vld [vmem:[#allocation7 + $0x644] ss:$24 sps:$4 sm:$0xff]   ;;  %v2108_v3 = vpop.f32.mrf.mxu1  ;;  %v2066_v10 = vadd.f32 %v2065_v60, %v564_v5 }
 0x146   : > { %2365 = vmatmul.mubr.bf16.vlgmr.msra.gmra.mxu1 %v3778_v14  ;;  %2377 = vmatprep.subr.bf16.mxu0 %v3469_v34  ;;  %v3482_v14 = vld [vmem:[#allocation7 + $0x640] ss:$24 sps:$4 sm:$0xff]   ;;  %v2067_v2 = vpop.f32.mrf.mxu0 }
 0x147   : > { %v2110_v9 = vpop.f32.mrf.mxu1  ;;  %v2068_v12 = vadd.f32 %v2067_v2, %v568_v6  ;;  %v2109_v16 = vadd.f32 %v2108_v3, %v2066_v10 }
 0x148   : > { %v2069_v8 = vpop.f32.mrf.mxu0 }
 0x149   : > { %2378 = vmatpush1.bf16.msra.mxu0 %v3467_v35  ;;  %v2112_v15 = vpop.f32.mrf.mxu1  ;;  %v2070_v17 = vadd.f32 %v2069_v8, %v564_v5  ;;  %v2111_v19 = vadd.f32 %v2110_v9, %v2068_v12  ;;  %v583_v8 = vsub.s32 5, %v3799_v58 }
 0x14a   : > { %2379 = vmatprep.subr.bf16.mxu0 %v3472_v36  ;;  %v2071_v13 = vpop.f32.mrf.mxu0 }
 0x14b   : > { %v2072_v20 = vadd.f32 %v2071_v13, %v568_v6  ;;  %v2114_v23 = vpop.f32.mrf.mxu1  ;;  %v2113_v26 = vadd.f32 %v2112_v15, %v2070_v17  ;;  %v584_v13 = vrot.slane %v3802_v63, %v583_v8 }
 0x14d   : > { %2380 = vmatpush1.bf16.msra.mxu0 %v3470_v37  ;;  %v2115_v28 = vadd.f32 %v2114_v23, %v2072_v20  ;;  %v571_v37 = vsub.s32 2, %v3799_v58 }
 0x14e   : > { %2381 = vmatprep.subr.bf16.mxu0 %v3475_v38 }
 0x151   : > { %2382 = vmatpush1.bf16.msra.mxu0 %v3473_v39  ;;  %v575_v39 = vsub.s32 3, %v3799_v58 }
 0x152   : > { %2383 = vmatprep.subr.bf16.mxu0 %v3478_v40  ;;  %v572_v40 = vrot.slane %v3802_v63, %v571_v37 }
 0x155   : > { %2384 = vmatpush1.bf16.msra.mxu0 %v3476_v41 }
 0x156   : > { %2385 = vmatprep.subr.bf16.mxu0 %v3481_v11  ;;  %v576_v11 = vrot.slane %v3802_v63, %v575_v39 }
 0x159   : > { %2386 = vmatpush1.bf16.msra.mxu0 %v3479_v49 }
 0x15a   : > { %2387 = vmatprep.subr.bf16.mxu0 %v3484_v43 }
 0x15d   : > { %2388 = vmatpush1.bf16.msra.mxu0 %v3482_v14 }
 0x15e   : > { %2389 = vmatprep.subr.bf16.mxu0 %v3487_v42 }
 0x161   : > { %2390 = vmatpush1.bf16.msra.mxu0 %v3485_v44 }
 0x162   : > { %2391 = vmatprep.subr.bf16.mxu0 %v3490_v45 }
 0x165   : > { %2392 = vmatpush2.bf16.msra.mxu0 %v3488_v55 }
 0x166   : > { %2393 = vmatprep.subr.bf16.mxu0 %v3493_v46 }
 0x169   : > { %2394 = vmatpush2.bf16.msra.mxu0 %v3491_v47 }
 0x16a   : > { %2395 = vmatprep.subr.bf16.mxu0 %v3496_v48 }
 0x16d   : > { %2396 = vmatpush2.bf16.msra.mxu0 %v3494_v50 }
 0x16e   : > { %2397 = vmatprep.subr.bf16.mxu0 %v3499_v51 }
 0x171   : > { %2398 = vmatpush2.bf16.msra.mxu0 %v3497_v52 }
 0x172   : > { %2399 = vmatprep.subr.bf16.mxu0 %v3502_v53 }
 0x175   : > { %2400 = vmatpush2.bf16.msra.mxu0 %v3500_v56 }
 0x176   : > { %2401 = vmatprep.subr.bf16.mxu0 %v3505_v57 }
 0x179   : > { %2402 = vmatpush2.bf16.msra.mxu0 %v3503_v59 }
 0x17a   : > { %2403 = vmatprep.subr.bf16.mxu0 %v3508_v61 }
 0x17d   : > { %2404 = vmatpush2.bf16.msra.mxu0 %v3506_v1 }
 0x17e   : > { %2405 = vmatprep.subr.bf16.mxu0 %v3511_v4 }
 0x181   : > { %2406 = vmatpush2.bf16.msra.mxu0 %v3509_v7  ;;  %v579_v7 = vsub.s32 4, %v3799_v58 }
 0x183   : > { %v580_v12 = vrot.slane %v3802_v63, %v579_v7 }
 0x184   : > { %v2151_v18 = vpop.f32.mrf.mxu0  ;;  %2408 = vmatmul.mubr.bf16.vlgmr.msra.gmra.mxu0 %v3786_v22 }
 0x185   : > { %v2152_v21 = vadd.f32 %v2151_v18, %v2109_v16 }
 0x186   : > { %v2153_v24 = vpop.f32.mrf.mxu0  ;;  %v2194_v36 = vpop.f32.mrf.mxu1 }
 0x187   : > { %v2154_v25 = vadd.f32 %v2153_v24, %v2111_v19  ;;  %v2418_v29 = vmul.f32 %v2152_v21, %v2152_v21  ;;  %v2195_v49 = vadd.f32 %v2194_v36, %v572_v40 }
 0x188   : > { %v2155_v27 = vpop.f32.mrf.mxu0  ;;  %v2196_v38 = vpop.f32.mrf.mxu1 }
 0x189   : > { %v2419_v30 = vmul.f32 %v2154_v25, %v2154_v25  ;;  %v2995_v31 = vpack.c.bf16 %v2154_v25, %v2152_v21  ;;  %v3808_v34 = vadd.f32 %v2155_v27, %v2113_v26  ;;  %v2197_v14 = vadd.f32 %v2196_v38, %v576_v11 }
 0x18a   : > { %v2157_v32 = vpop.f32.mrf.mxu0  ;;  %v2198_v41 = vpop.f32.mrf.mxu1 }
 0x18b   : > { %v2431_v33 = vadd.f32 %v2419_v30, %v2418_v29  ;;  %2496 = vst [vmem:[#allocation2 + $0x28] sm:$0xff] %v2995_v31  ;;  %v3810_v35 = vadd.f32 %v2157_v32, %v2115_v28  ;;  %v2199_v46 = vadd.f32 %v2198_v41, %v572_v40  ;;  %v2424_v38 = vmul.f32 %v3808_v34, %v3808_v34 }
 0x18c   : > { %v2200_v43 = vpop.f32.mrf.mxu1 }
 0x18d   : > { %v2998_v22 = vpack.c.bf16 %v3810_v35, %v3808_v34  ;;  %v2201_v52 = vadd.f32 %v2200_v43, %v576_v11  ;;  %v2425_v11 = vmul.f32 %v3810_v35, %v3810_v35  ;;  %v3660_v34 = vmov 0.0  }
 0x18e   : > { %252 = vst.msk [vmem:[#allocation3] sm:$0x1] %vm251_vm0, %v3660_v34 }
 0x18f   : > { %2499 = vst [vmem:[#allocation2] sm:$0xff] %v2998_v22 }
 0x1c4   : > { %v2237_v42 = vpop.f32.mrf.mxu0 }
 0x1c5   : > { %v2238_v44 = vadd.f32 %v2237_v42, %v2195_v49 }
 0x1c6   : > { %v2239_v45 = vpop.f32.mrf.mxu0  ;;  %v2280_v55 = vpop.f32.mrf.mxu1 }
 0x1c7   : > { %v2240_v47 = vadd.f32 %v2239_v45, %v2197_v14  ;;  %v2281_v48 = vadd.f32 %v2280_v55, %v2238_v44 }
 0x1c8   : > { %v2241_v50 = vpop.f32.mrf.mxu0  ;;  %v2282_v51 = vpop.f32.mrf.mxu1 }
 0x1c9   : > { %v2420_v53 = vmul.f32 %v2281_v48, %v2281_v48  ;;  %v2242_v54 = vadd.f32 %v2241_v50, %v2199_v46  ;;  %v2283_v56 = vadd.f32 %v2282_v51, %v2240_v47 }
 0x1ca   : > { %v2243_v57 = vpop.f32.mrf.mxu0  ;;  %v2284_v59 = vpop.f32.mrf.mxu1 }
 0x1cb   : > { %v2432_v60 = vadd.f32 %v2431_v33, %v2420_v53  ;;  %v2421_v61 = vmul.f32 %v2283_v56, %v2283_v56  ;;  %v2996_v62 = vpack.c.bf16 %v2283_v56, %v2281_v48  ;;  %v2244_v0 = vadd.f32 %v2243_v57, %v2201_v52 }
 0x1cc   : > { %v2286_v1 = vpop.f32.mrf.mxu1  ;;  %v2285_v3 = vadd.f32 %v2284_v59, %v2242_v54  ;;  %v2430_v59 = vld [vmem:[#allocation3] sm:$0x1] }
 0x1cd   : > { %v2433_v2 = vadd.f32 %v2432_v60, %v2421_v61  ;;  %2497 = vst [vmem:[#allocation2 + $0x10] sm:$0xff] %v2996_v62  ;;  %v2287_v4 = vadd.f32 %v2286_v1, %v2244_v0 }
 0x1ce   : > { %v2426_v14 = vmul.f32 %v2285_v3, %v2285_v3 }
 0x1cf   : > { %v2999_v5 = vpack.c.bf16 %v2287_v4, %v2285_v3  ;;  %v2427_v44 = vmul.f32 %v2287_v4, %v2287_v4 }
 0x1d1   : > { %2500 = vst [vmem:[#allocation2 + $0x18] sm:$0xff] %v2999_v5 }
 0x204   : > { %v2323_v6 = vpop.f32.mrf.mxu0 }
 0x205   : > { %v2324_v17 = vadd.f32 %v2323_v6, %v580_v12 }
 0x206   : > { %v2325_v9 = vpop.f32.mrf.mxu0  ;;  %v2366_v10 = vpop.f32.mrf.mxu1 }
 0x207   : > { %v2326_v18 = vadd.f32 %v2325_v9, %v584_v13  ;;  %v2367_v21 = vadd.f32 %v2366_v10, %v2324_v17 }
 0x208   : > { %v2327_v15 = vpop.f32.mrf.mxu0  ;;  %v2368_v16 = vpop.f32.mrf.mxu1 }
 0x209   : > { %v2328_v23 = vadd.f32 %v2327_v15, %v580_v12  ;;  %v2369_v25 = vadd.f32 %v2368_v16, %v2326_v18 }
 0x20a   : > { %v2329_v19 = vpop.f32.mrf.mxu0  ;;  %v2370_v20 = vpop.f32.mrf.mxu1 }
 0x20b   : > { %v2330_v26 = vadd.f32 %v2329_v19, %v584_v13  ;;  %v2371_v31 = vadd.f32 %v2370_v20, %v2328_v23 }
 0x20c   : > { %v2372_v28 = vpop.f32.mrf.mxu1 }
 0x20d   : > { %v2373_v33 = vadd.f32 %v2372_v28, %v2330_v26 }
 0x244   : > { %v2409_v24 = vpop.f32.mrf.mxu0 }
 0x245   : > { %v2410_v27 = vadd.f32 %v2409_v24, %v2367_v21 }
 0x246   : > { %v2411_v58 = vpop.f32.mrf.mxu0 }
 0x247   : > { %v2422_v29 = vmul.f32 %v2410_v27, %v2410_v27  ;;  %v2412_v30 = vadd.f32 %v2411_v58, %v2369_v25 }
 0x248   : > { %v2413_v32 = vpop.f32.mrf.mxu0 }
 0x249   : > { %v2434_v63 = vadd.f32 %v2433_v2, %v2422_v29  ;;  %v2423_v22 = vmul.f32 %v2412_v30, %v2412_v30  ;;  %v2997_v36 = vpack.c.bf16 %v2412_v30, %v2410_v27  ;;  %v2414_v40 = vadd.f32 %v2413_v32, %v2371_v31 }
 0x24a   : > { %v2415_v37 = vpop.f32.mrf.mxu0 }
 0x24b   : > { %v2435_v39 = vadd.f32 %v2434_v63, %v2423_v22  ;;  %2498 = vst [vmem:[#allocation2 + $0x8] sm:$0xff] %v2997_v36  ;;  %v2416_v41 = vadd.f32 %v2415_v37, %v2373_v33  ;;  %v2428_v55 = vmul.f32 %v2414_v40, %v2414_v40 }
 0x24d   : > { %v2436_v49 = vadd.f32 %v2435_v39, %v2424_v38  ;;  %v3000_v43 = vpack.c.bf16 %v2416_v41, %v2414_v40  ;;  %v2429_v47 = vmul.f32 %v2416_v41, %v2416_v41 }
 0x24f   : > { %2501 = vst [vmem:[#allocation2 + $0x20] sm:$0xff] %v3000_v43  ;;  %v2437_v42 = vadd.f32 %v2436_v49, %v2425_v11 }
 0x251   : > { %v2438_v45 = vadd.f32 %v2437_v42, %v2426_v14 }
 0x253   : > { %v2439_v46 = vadd.f32 %v2438_v45, %v2427_v44 }
 0x255   : > { %v2440_v48 = vadd.f32 %v2439_v46, %v2428_v55 }
 0x257   : > { %v2441_v50 = vadd.f32 %v2440_v48, %v2429_v47 }
 0x259   : > { %2442 = vadd.xlane.f32.xlu0 %v2441_v50 }
 0x2e2   : > { %v2443_v51 = vpop.xlane.xlu0 %2442 }
 0x2e3   : > { %v2444_v52 = vrot.slane %v2443_v51, 4 }
 0x2e5   : > { %v2445_v53 = vadd.f32 %v2444_v52, %v2443_v51 }
 0x2e7   : > { %v2446_v35 = vrot.slane %v2445_v53, 2 }
 0x2e9   : > { %v2447_v54 = vadd.f32 %v2446_v35, %v2445_v53 }
 0x2eb   : > { %v2448_v56 = vrot.slane %v2447_v54, 1 }
 0x2ed   : > { %v2449_v57 = vadd.f32 %v2448_v56, %v2447_v54 }
 0x2ef   : > { %3001 = vpush %v2449_v57 }
 0x320   : > { %s3002_s18 = spop %3001 }
 0x321   : > { %v2451_v60 = vstv %s3002_s18 }
 0x322   : > { %v2452_v61 = vadd.f32 %v2451_v60, %v2430_v59 }
 0x324   : > { %2454 = vst.msk [vmem:[#allocation3] sm:$0x1] %vm251_vm0, %v2452_v61 }
 0x325 PF: > { %p2990_p3 = scmp.ne.s32.totalorder %s3643_s12, 1 }
 0x327   : > { %2505 = sbr.rel (%p2990_p3) target bundleno = 962 (0x3c2), region = 56 }
 0x32c   : > { %v2506_v62 = vld [vmem:[#allocation3] sm:$0x1]  ;;  %v3661_v0 = vmov 0   ;;  %v2532_v1 = vlaneseq  ;;  %v2513_v6 = vld [vmem:[#allocation2 + $0x28] sm:$0xff]  ;;  %v2516_v9 = vld [vmem:[#allocation2] sm:$0xff] }
 0x32d   : > { %3512 = vset.pattern.permute.xlu0 %v3661_v0  ;;  %3513 = vrsqrt.f32 %v2506_v62  ;;  %v2514_v7 = vld [vmem:[#allocation2 + $0x10] sm:$0xff]  ;;  %v2515_v8 = vld [vmem:[#allocation2 + $0x8] sm:$0xff]  ;;  %v2517_v10 = vld [vmem:[#allocation2 + $0x18] sm:$0xff]  ;;  %v2519_v13 = vunpack.c.l.bf16 %v2513_v6  ;;  %v2520_v15 = vunpack.c.h.bf16 %v2513_v6  ;;  %v2525_v20 = vunpack.c.l.bf16 %v2516_v9 }
 0x32e   : > { %v2533_v2 = vshrl.u32 %v2532_v1, 7  ;;  %v2518_v12 = vld [vmem:[#allocation2 + $0x20] sm:$0xff]  ;;  %v2521_v16 = vunpack.c.l.bf16 %v2514_v7  ;;  %v2522_v17 = vunpack.c.h.bf16 %v2514_v7  ;;  %v2523_v18 = vunpack.c.l.bf16 %v2515_v8 }
 0x32f   : > { %v2524_v19 = vunpack.c.h.bf16 %v2515_v8  ;;  %v2526_v21 = vunpack.c.h.bf16 %v2516_v9  ;;  %v2527_v23 = vunpack.c.l.bf16 %v2517_v10  ;;  %v2528_v24 = vunpack.c.h.bf16 %v2517_v10 }
 0x330   : > { %v2534_v3 = vsub.s32 0, %v2533_v2  ;;  %v2529_v25 = vunpack.c.l.bf16 %v2518_v12  ;;  %v2530_v26 = vunpack.c.h.bf16 %v2518_v12 }
 0x33a   : > { %v3514_v4 = vpop.eup %3513 }
 0x33b   : > { %v2535_v5 = vrot.slane %v3514_v4, %v2534_v3 }
 0x33d   : > { %2537 = vperm.xlu0 %3512, %v2535_v5  }
 0x3b8   : > { %v2538_v27 = vpop.permute.xlu0 %2537 }
 0x3b9   : > { %v2540_v28 = vmul.f32 %v2538_v27, %v2519_v13  ;;  %v2541_v58 = vmul.f32 %v2538_v27, %v2520_v15  ;;  %v2542_v29 = vmul.f32 %v2538_v27, %v2521_v16  ;;  %v2543_v30 = vmul.f32 %v2538_v27, %v2522_v17 }
 0x3ba   : > { %v2544_v31 = vmul.f32 %v2538_v27, %v2523_v18  ;;  %v2545_v32 = vmul.f32 %v2538_v27, %v2524_v19  ;;  %v2546_v33 = vmul.f32 %v2538_v27, %v2525_v20  ;;  %v2547_v63 = vmul.f32 %v2538_v27, %v2526_v21 }
 0x3bb   : > { %v2548_v22 = vmul.f32 %v2538_v27, %v2527_v23  ;;  %v2549_v36 = vmul.f32 %v2538_v27, %v2528_v24  ;;  %v2550_v37 = vmul.f32 %v2538_v27, %v2529_v25  ;;  %v2551_v38 = vmul.f32 %v2538_v27, %v2530_v26  ;;  %2552 = vst [vmem:[#allocation10] sm:$0xff] %v2540_v28 }
 0x3bc   : > { %2553 = vst [vmem:[#allocation10 + $0x8] sm:$0xff] %v2541_v58  ;;  %2554 = vst [vmem:[#allocation10 + $0x10] sm:$0xff] %v2542_v29 }
 0x3bd   : > { %2555 = vst [vmem:[#allocation10 + $0x18] sm:$0xff] %v2543_v30  ;;  %2556 = vst [vmem:[#allocation10 + $0x20] sm:$0xff] %v2544_v31 }
 0x3be   : > { %2557 = vst [vmem:[#allocation10 + $0x28] sm:$0xff] %v2545_v32  ;;  %2558 = vst [vmem:[#allocation10 + $0x30] sm:$0xff] %v2546_v33 }
 0x3bf   : > { %2559 = vst [vmem:[#allocation10 + $0x38] sm:$0xff] %v2547_v63  ;;  %2560 = vst [vmem:[#allocation10 + $0x40] sm:$0xff] %v2548_v22 }
 0x3c0   : > { %2561 = vst [vmem:[#allocation10 + $0x48] sm:$0xff] %v2549_v36  ;;  %2562 = vst [vmem:[#allocation10 + $0x50] sm:$0xff] %v2550_v37 }
 0x3c1   : > { %2563 = vst [vmem:[#allocation10 + $0x58] sm:$0xff] %v2551_v38 }
 0x3c2 PF: > { %p3829_p4 = scmp.eq.s32.totalorder %s2684_s15, 1  ;;  %s3662_s19 = smov [#allocation10]  }
 0x3c3   : > { %s2580_s23 = sshll.u32 %s3662_s19, 4  ;;  %s2581_s23 = int_to_ptr.vmem [resolvable:$true] %s2580_s23 }
 0x3c4   : > { %s3593_s24 = scalar_lea.vmem %s2581_s23, 1536  ;;  %s3599_s25 = scalar_lea.vmem %s2581_s23, 3072 }
 0x3c5   : > { %p3594_p6 = scmp.ne.s32.totalorder %s2581_s23, %s3593_s24  ;;  %p3600_p9 = scmp.lt.s32.totalorder %s2581_s23, %s2581_s23 }
 0x3c6   : > { %p3601_p10 = scmp.lt.s32.totalorder %s3599_s25, %s3593_s24 }
 0x3c7   : > { %p3595_p5 = pnand %p3594_p6, %p3829_p4 }
 0x3c8   : > { %p3602_p11 = por %p3601_p10, %p3600_p9 }
 0x3c9   : > { %p3596_p2 = pneg %p3595_p5 }
 0x3cb   : > { %p3603_p13 = pnand %p3602_p11, %p3596_p2 }
 0x3cd   : > { %3606 = shalt.err (!%p3603_p13)
}
 0x3ce   : > { %s3663_s26 = smov 768   ;;  %s3664_s15 = smov 48  }
 0x3cf   : > { %3016 = dma.vmem_to_hbm [thread:$0]  (%p3829_p4), %s2581_s23, 1536, %s3856_s3, [#allocation6], %s3663_s26, %s3663_s26, %s3664_s15  }
 0x3d0 PF: > { %p3043_p12 = scmp.eq.s32.totalorder %s2685_s16, 1  ;;  %p3862_p0 = scmp.ge.s32.totalorder %s3651_s14, 2 }
 0x3d2   : > { %p3031_p1 = pnand %p3043_p12, %p3862_p0 }
 0x3d4   : > { %p3032_p7 = pneg %p3031_p1 }
 0x3d6   : > { %3638 = dma.done.wait (%p3032_p7), [#allocation6], 1536  }
 0x3d7   : > { %3640 = vsyncadd (%p3032_p7), [#allocation6], 4294965760  ;;  %s20_s14 = sadd.s32 1, %s3651_s14   ;;  %s3863_s12 = smov %s3647_s13 }
 0x3d8   : > { %p17_p8 = scmp.ge.s32.totalorder %s20_s14, 4   ;;  %s3864_s13 = smov %s3866_s17 }
 0x3da   :  { %19 = sbr.rel (!%p17_p8) target bundleno = 6 (0x6), region = 99 }
 0x3df   :  { %2601 = vsyncpa [#allocation5], 1 }
 0x3e0   :  { %2603 = vsyncpa [#allocation5 + $0x1], 1 }
 0x3e1   :  { %2604 = vsyncpa [#allocation8], 1 }
 0x3e2   :  { %2605 = vsyncpa [#allocation6], 1 }
 0x3e3   :  { %2607 = vsyncpa [#allocation6 + $0x1], 1 }

</bundles_post_ra>
